<compile_context>
chip_gen: v7x
topology: tpu7x:2x2x1
jax: 0.10.0
libtpu: 0.0.40
codegen_flags: <defaults>
</compile_context>

<pallas_src>
import math

import jax
import jax.numpy as jnp
from jax import lax
from jax.experimental import pallas as pl
from jax.experimental.pallas import tpu as pltpu


# ---------------------------------------------------------------------------
# helpers
# ---------------------------------------------------------------------------
def _pick_tile(dim, preferred):
    """Largest preferred tile that evenly divides `dim`, else the full dim."""
    for t in preferred:
        if dim >= t and dim % t == 0:
            return t
    return dim


def _time_chunk(S, max_chunk=32):
    """Time steps handled per grid iteration of the recurrent kernel."""
    for c in (32, 16, 8, 4, 2, 1):
        if c <= max_chunk and S % c == 0:
            return c
    return 1


# ---------------------------------------------------------------------------
# Pallas kernel: tiled linear  y = x @ W^T + b   (W pre-transposed to (K, N))
# used for both the hoisted LSTM input projection and the decoder.
# ---------------------------------------------------------------------------
def _linear_kernel(x_ref, w_ref, b_ref, out_ref, acc_ref):
    k = pl.program_id(2)

    @pl.when(k == 0)
    def _():
        acc_ref[...] = jnp.zeros_like(acc_ref)

    acc_ref[...] += jnp.dot(x_ref[...], w_ref[...],
                            preferred_element_type=jnp.float32)

    @pl.when(k == pl.num_programs(2) - 1)
    def _():
        out_ref[...] = (acc_ref[...]
                        + b_ref[...].astype(jnp.float32)).astype(out_ref.dtype)


def linear(x, w_t, b, out_dtype=None):
    """x: (M, K), w_t: (K, N), b: (1, N)  ->  (M, N)."""
    M, K = x.shape
    N = w_t.shape[-1]
    out_dtype = out_dtype or x.dtype

    tm = _pick_tile(M, (256, 128))
    tn = _pick_tile(N, (256, 128))
    tk = _pick_tile(K, (512, 256, 128))

    flops = 2 * M * N * K
    bytes_accessed = (M * K + K * N + M * N + N) * jnp.dtype(x.dtype).itemsize

    return pl.pallas_call(
        _linear_kernel,
        out_shape=jax.ShapeDtypeStruct((M, N), out_dtype),
        grid_spec=pltpu.PrefetchScalarGridSpec(
            num_scalar_prefetch=0,
            grid=(M // tm, N // tn, K // tk),
            in_specs=[
                pl.BlockSpec((tm, tk), lambda i, j, k: (i, k)),
                pl.BlockSpec((tk, tn), lambda i, j, k: (k, j)),
                pl.BlockSpec((1, tn), lambda i, j, k: (0, j)),
            ],
            out_specs=pl.BlockSpec((tm, tn), lambda i, j, k: (i, j)),
            scratch_shapes=[pltpu.VMEM((tm, tn), jnp.float32)],
        ),
        compiler_params=pltpu.CompilerParams(
            dimension_semantics=("parallel", "parallel", "arbitrary")),
        cost_estimate=pl.CostEstimate(flops=flops, transcendentals=0,
                                      bytes_accessed=bytes_accessed),
    )(x, w_t, b)


# ---------------------------------------------------------------------------
# Pallas kernel: LSTM recurrence over time, chunked along the time axis.
# gates_x = x @ W_ih^T + b is precomputed; here we only do
#   gates_t = gates_x[t] + h_{t-1} @ W_hh^T ;  i,f,g,o ;  c,h update
# h/c carries live in f32 VMEM scratch and persist across grid iterations.
# ---------------------------------------------------------------------------
def _lstm_recurrent_kernel(gx_ref, whh_ref, h0_ref, c0_ref,
                           y_ref, hT_ref, cT_ref,
                           h_scr, c_scr):
    @pl.when(pl.program_id(0) == 0)
    def _():
        h_scr[...] = h0_ref[...].astype(jnp.float32)
        c_scr[...] = c0_ref[...].astype(jnp.float32)

    H = h_scr.shape[-1]
    T = gx_ref.shape[0]          # static chunk length
    w_dtype = whh_ref.dtype

    def step(i, carry):
        gates = (jnp.dot(h_scr[...].astype(w_dtype), whh_ref[...],
                         preferred_element_type=jnp.float32)
                 + gx_ref[i].astype(jnp.float32))            # (B, 4H)
        # PyTorch nn.LSTM gate order: i, f, g, o
        i_g = jax.nn.sigmoid(gates[:, 0 * H:1 * H])
        f_g = jax.nn.sigmoid(gates[:, 1 * H:2 * H])
        g_g = jnp.tanh(gates[:, 2 * H:3 * H])
        o_g = jax.nn.sigmoid(gates[:, 3 * H:4 * H])

        c_new = f_g * c_scr[...] + i_g * g_g
        h_new = o_g * jnp.tanh(c_new)

        h_scr[...] = h_new
        c_scr[...] = c_new
        y_ref[i] = h_new.astype(y_ref.dtype)
        return carry

    lax.fori_loop(0, T, step, 0, unroll=True)

    # Write the carries back every chunk (cheap) so hT/cT are always valid.
    hT_ref[...] = h_scr[...].astype(hT_ref.dtype)
    cT_ref[...] = c_scr[...].astype(cT_ref.dtype)


def lstm_recurrence(gates_x, h0, c0, whh_t):
    """gates_x: (S, B, 4H), h0/c0: (B, H), whh_t: (H, 4H) ->
       (y: (S, B, H), hT: (B, H), cT: (B, H))."""
    S, B, G = gates_x.shape
    H = h0.shape[-1]
    assert G == 4 * H
    t_chunk = _time_chunk(S)
    dt = gates_x.dtype

    # TODO(synk): for large B on v7x, add a leading batch-tile "parallel" grid
    # axis so the recurrence is sharded across the 2 TensorCores.
    return pl.pallas_call(
        _lstm_recurrent_kernel,
        out_shape=(
            jax.ShapeDtypeStruct((S, B, H), dt),
            jax.ShapeDtypeStruct((B, H), h0.dtype),
            jax.ShapeDtypeStruct((B, H), c0.dtype),
        ),
        grid_spec=pltpu.PrefetchScalarGridSpec(
            num_scalar_prefetch=0,
            grid=(S // t_chunk,),
            in_specs=[
                pl.BlockSpec((t_chunk, B, 4 * H), lambda t: (t, 0, 0)),  # gates_x
                pl.BlockSpec((H, 4 * H), lambda t: (0, 0)),              # W_hh^T
                pl.BlockSpec((B, H), lambda t: (0, 0)),                  # h0
                pl.BlockSpec((B, H), lambda t: (0, 0)),                  # c0
            ],
            out_specs=[
                pl.BlockSpec((t_chunk, B, H), lambda t: (t, 0, 0)),      # y
                pl.BlockSpec((B, H), lambda t: (0, 0)),                  # hT
                pl.BlockSpec((B, H), lambda t: (0, 0)),                  # cT
            ],
            scratch_shapes=[
                pltpu.VMEM((B, H), jnp.float32),   # h carry
                pltpu.VMEM((B, H), jnp.float32),   # c carry
            ],
        ),
        compiler_params=pltpu.CompilerParams(
            dimension_semantics=("arbitrary",)),   # recurrence: sequential
    )(gates_x, whh_t, h0, c0)


# ---------------------------------------------------------------------------
# Model: parameter init + forward (mirrors RNNModel with rnn_type='LSTM')
# Weights are stored pre-transposed and biases pre-summed (no per-call .T).
# ---------------------------------------------------------------------------
def init_params(key, ntoken, ninp, nhid, nlayers, dtype=jnp.float32):
    keys = jax.random.split(key, 2 + 4 * nlayers)
    initrange = 0.1
    params = {
        # encoder / decoder init as in RNNModel.init_weights
        "embedding": jax.random.uniform(keys[0], (ntoken, ninp), dtype,
                                        -initrange, initrange),
        "dec_w_t": jax.random.uniform(keys[1], (ntoken, nhid), dtype,
                                      -initrange, initrange).T,   # (H, V)
        "dec_b": jnp.zeros((1, ntoken), dtype),
        "layers": [],
    }
    for l in range(nlayers):
        k = 1.0 / math.sqrt(nhid)
        in_sz = ninp if l == 0 else nhid
        kw = keys[2 + 4 * l: 2 + 4 * (l + 1)]
        # PyTorch nn.LSTM parameter shapes / default init U(-1/sqrt(H), 1/sqrt(H))
        wih = jax.random.uniform(kw[0], (4 * nhid, in_sz), dtype, -k, k)
        whh = jax.random.uniform(kw[1], (4 * nhid, nhid), dtype, -k, k)
        bih = jax.random.uniform(kw[2], (4 * nhid,), dtype, -k, k)
        bhh = jax.random.uniform(kw[3], (4 * nhid,), dtype, -k, k)
        params["layers"].append({
            "wih_t": wih.T,                 # (In, 4H)  pre-transposed
            "whh_t": whh.T,                 # (H, 4H)   pre-transposed
            "b": (bih + bhh)[None, :],      # (1, 4H)   pre-summed
        })
    # TODO(synk): for large nhid / large vocab, store these weights in bf16
    # (keep f32 accumulators / h,c scratch) to halve VMEM and hit MXU bf16 peak.
    return params


@jax.jit
def rnn_model_forward(params, observation, hidden):
    """observation: (S, B) int32; hidden = (h0, c0) each (nlayers, B, H)."""
    h0_all, c0_all = hidden

    # encoder + dropout (identity in eval)
    emb = jnp.take(params["embedding"], observation, axis=0)   # (S, B, ninp)
    S, B, _ = emb.shape

    x = emb
    h_out, c_out = [], []
    for l, lp in enumerate(params["layers"]):
        In = x.shape[-1]
        H = lp["whh_t"].shape[0]
        # Hoisted input projection for the whole sequence: one big MXU GEMM.
        gates_x = linear(x.reshape(S * B, In), lp["wih_t"], lp["b"])
        gates_x = gates_x.reshape(S, B, 4 * H)
        # Sequential recurrence: only h @ W_hh^T + gates_x[t] per step.
        x, hT, cT = lstm_recurrence(gates_x, h0_all[l], c0_all[l], lp["whh_t"])
        h_out.append(hT)
        c_out.append(cT)
        # TODO(synk): inter-layer dropout is identity here (eval-mode forward).

    H = x.shape[-1]
    V = params["dec_w_t"].shape[-1]
    decoded = linear(x.reshape(S * B, H), params["dec_w_t"], params["dec_b"])
    decoded = decoded.reshape(S, B, V)

    new_hidden = (jnp.stack(h_out, axis=0), jnp.stack(c_out, axis=0))
    decoded_aux = None  # aux_objective=False
    return decoded, new_hidden, decoded_aux


if __name__ == "__main__":
    # small shapes consistent with the module
    ntoken, ninp, nhid, nlayers = 64, 32, 32, 2
    seq_len, bsz = 8, 2

    key = jax.random.PRNGKey(0)
    pkey, okey = jax.random.split(key)

    params = init_params(pkey, ntoken, ninp, nhid, nlayers)

    observation = jax.random.randint(okey, (seq_len, bsz), 0, ntoken,
                                     dtype=jnp.int32)
    # init_hidden: zeros for (h, c), shape (nlayers, bsz, nhid)
    hidden = (jnp.zeros((nlayers, bsz, nhid), jnp.float32),
              jnp.zeros((nlayers, bsz, nhid), jnp.float32))

    decoded, new_hidden, decoded_aux = rnn_model_forward(params, observation,
                                                         hidden)
    jax.block_until_ready((decoded, new_hidden))

    assert decoded.shape == (seq_len, bsz, ntoken)
    assert new_hidden[0].shape == (nlayers, bsz, nhid)
    assert new_hidden[1].shape == (nlayers, bsz, nhid)
    assert decoded_aux is None
    print("KERNEL_OK")
</pallas_src>

<mosaic_0001>
module attributes {stable_mosaic.version = 11 : i64} {
  func.func @_linear_kernel(%arg0: i32, %arg1: i32, %arg2: i32, %arg3: memref<16x32xf32, #tpu.memory_space<vmem>>, %arg4: memref<32x128xf32, #tpu.memory_space<vmem>>, %arg5: memref<1x128xf32, #tpu.memory_space<vmem>>, %arg6: memref<16x128xf32, #tpu.memory_space<vmem>>, %arg7: memref<16x128xf32, #tpu.memory_space<vmem>>) attributes {dimension_semantics = [#tpu.dimension_semantics<parallel>, #tpu.dimension_semantics<parallel>, #tpu.dimension_semantics<arbitrary>], iteration_bounds = array<i64: 1, 1, 1>, scalar_prefetch = 0 : i64, scratch_operands = 1 : i64, tpu.core_type = #tpu.core_type<tc>, window_params = [{transform_indices = @transform_0, window_bounds = array<i64: 16, 32>}, {transform_indices = @transform_1, window_bounds = array<i64: 32, 128>}, {transform_indices = @transform_2, window_bounds = array<i64: 1, 128>}, {transform_indices = @transform_3, window_bounds = array<i64: 16, 128>}]} {
    %c0_i32 = arith.constant 0 : i32
    %0 = arith.cmpi eq, %arg2, %c0_i32 : i32
    %1 = arith.extui %0 : i1 to i32
    %c0_i32_0 = arith.constant 0 : i32
    %2 = arith.cmpi ne, %1, %c0_i32_0 : i32
    scf.if %2 {
      %cst_10 = arith.constant 0.000000e+00 : f32
      %12 = vector.broadcast %cst_10 : f32 to vector<16x128xf32>
      %c0_11 = arith.constant 0 : index
      %c0_12 = arith.constant 0 : index
      %13 = vector.load %arg7[%c0_11, %c0_12] : memref<16x128xf32, #tpu.memory_space<vmem>>, vector<16x128xf32>
      tpu.vector_store %arg7[%c0_11, %c0_12], %12 {strides = array<i32>} : memref<16x128xf32, #tpu.memory_space<vmem>>, vector<16x128xf32>,
    } else {
    }
    %c0 = arith.constant 0 : index
    %c0_1 = arith.constant 0 : index
    %3 = vector.load %arg7[%c0, %c0_1] : memref<16x128xf32, #tpu.memory_space<vmem>>, vector<16x128xf32>
    %c0_2 = arith.constant 0 : index
    %c0_3 = arith.constant 0 : index
    %4 = vector.load %arg3[%c0_2, %c0_3] : memref<16x32xf32, #tpu.memory_space<vmem>>, vector<16x32xf32>
    %c0_4 = arith.constant 0 : index
    %c0_5 = arith.constant 0 : index
    %5 = vector.load %arg4[%c0_4, %c0_5] : memref<32x128xf32, #tpu.memory_space<vmem>>, vector<32x128xf32>
    %cst = arith.constant dense<0.000000e+00> : vector<16x128xf32>
    %6 = tpu.matmul %4, %5, %cst {dimension_numbers = #tpu.dot_dimension_numbers<[1], [0], [0], [1], [0, 0, 1, 1], [], []>} : vector<16x32xf32>, vector<32x128xf32>, vector<16x128xf32> -> vector<16x128xf32>
    %7 = arith.addf %3, %6 : vector<16x128xf32>
    %c0_6 = arith.constant 0 : index
    %c0_7 = arith.constant 0 : index
    %8 = vector.load %arg7[%c0_6, %c0_7] : memref<16x128xf32, #tpu.memory_space<vmem>>, vector<16x128xf32>
    tpu.vector_store %arg7[%c0_6, %c0_7], %7 {strides = array<i32>} : memref<16x128xf32, #tpu.memory_space<vmem>>, vector<16x128xf32>,
    %c0_i32_8 = arith.constant 0 : i32
    %9 = arith.cmpi eq, %arg2, %c0_i32_8 : i32
    %10 = arith.extui %9 : i1 to i32
    %c0_i32_9 = arith.constant 0 : i32
    %11 = arith.cmpi ne, %10, %c0_i32_9 : i32
    scf.if %11 {
      %c0_10 = arith.constant 0 : index
      %c0_11 = arith.constant 0 : index
      %12 = vector.load %arg7[%c0_10, %c0_11] : memref<16x128xf32, #tpu.memory_space<vmem>>, vector<16x128xf32>
      %c0_12 = arith.constant 0 : index
      %c0_13 = arith.constant 0 : index
      %13 = vector.load %arg5[%c0_12, %c0_13] : memref<1x128xf32, #tpu.memory_space<vmem>>, vector<1x128xf32>
      %14 = vector.broadcast %13 : vector<1x128xf32> to vector<16x128xf32>
      %15 = arith.addf %12, %14 : vector<16x128xf32>
      %c0_14 = arith.constant 0 : index
      %c0_15 = arith.constant 0 : index
      %16 = vector.load %arg6[%c0_14, %c0_15] : memref<16x128xf32, #tpu.memory_space<vmem>>, vector<16x128xf32>
      tpu.vector_store %arg6[%c0_14, %c0_15], %15 {strides = array<i32>} : memref<16x128xf32, #tpu.memory_space<vmem>>, vector<16x128xf32>,
    } else {
    }
    return
  }
  func.func @transform_0(%arg0: i32, %arg1: i32, %arg2: i32) -> (i32, i32) {
    %c0_i32 = arith.constant 0 : i32
    return %arg0, %arg2 : i32, i32
  }
  func.func @transform_1(%arg0: i32, %arg1: i32, %arg2: i32) -> (i32, i32) {
    %c0_i32 = arith.constant 0 : i32
    return %arg2, %arg1 : i32, i32
  }
  func.func @transform_2(%arg0: i32, %arg1: i32, %arg2: i32) -> (i32, i32) {
    %c0_i32 = arith.constant 0 : i32
    %c0_i32_0 = arith.constant 0 : i32
    return %c0_i32, %arg1 : i32, i32
  }
  func.func @transform_3(%arg0: i32, %arg1: i32, %arg2: i32) -> (i32, i32) {
    %c0_i32 = arith.constant 0 : i32
    return %arg0, %arg1 : i32, i32
  }
}

module attributes {stable_mosaic.version = 11 : i64} {
  func.func @_linear_kernel(%arg0: i32, %arg1: i32, %arg2: i32, %arg3: memref<16x32xf32, #tpu.memory_space<vmem>>, %arg4: memref<32x64xf32, #tpu.memory_space<vmem>>, %arg5: memref<1x64xf32, #tpu.memory_space<vmem>>, %arg6: memref<16x64xf32, #tpu.memory_space<vmem>>, %arg7: memref<16x64xf32, #tpu.memory_space<vmem>>) attributes {dimension_semantics = [#tpu.dimension_semantics<parallel>, #tpu.dimension_semantics<parallel>, #tpu.dimension_semantics<arbitrary>], iteration_bounds = array<i64: 1, 1, 1>, scalar_prefetch = 0 : i64, scratch_operands = 1 : i64, tpu.core_type = #tpu.core_type<tc>, window_params = [{transform_indices = @transform_0, window_bounds = array<i64: 16, 32>}, {transform_indices = @transform_1, window_bounds = array<i64: 32, 64>}, {transform_indices = @transform_2, window_bounds = array<i64: 1, 64>}, {transform_indices = @transform_3, window_bounds = array<i64: 16, 64>}]} {
    %c0_i32 = arith.constant 0 : i32
    %0 = arith.cmpi eq, %arg2, %c0_i32 : i32
    %1 = arith.extui %0 : i1 to i32
    %c0_i32_0 = arith.constant 0 : i32
    %2 = arith.cmpi ne, %1, %c0_i32_0 : i32
    scf.if %2 {
      %cst_10 = arith.constant 0.000000e+00 : f32
      %12 = vector.broadcast %cst_10 : f32 to vector<16x64xf32>
      %c0_11 = arith.constant 0 : index
      %c0_12 = arith.constant 0 : index
      %13 = vector.load %arg7[%c0_11, %c0_12] : memref<16x64xf32, #tpu.memory_space<vmem>>, vector<16x64xf32>
      tpu.vector_store %arg7[%c0_11, %c0_12], %12 {strides = array<i32>} : memref<16x64xf32, #tpu.memory_space<vmem>>, vector<16x64xf32>,
    } else {
    }
    %c0 = arith.constant 0 : index
    %c0_1 = arith.constant 0 : index
    %3 = vector.load %arg7[%c0, %c0_1] : memref<16x64xf32, #tpu.memory_space<vmem>>, vector<16x64xf32>
    %c0_2 = arith.constant 0 : index
    %c0_3 = arith.constant 0 : index
    %4 = vector.load %arg3[%c0_2, %c0_3] : memref<16x32xf32, #tpu.memory_space<vmem>>, vector<16x32xf32>
    %c0_4 = arith.constant 0 : index
    %c0_5 = arith.constant 0 : index
    %5 = vector.load %arg4[%c0_4, %c0_5] : memref<32x64xf32, #tpu.memory_space<vmem>>, vector<32x64xf32>
    %cst = arith.constant dense<0.000000e+00> : vector<16x64xf32>
    %6 = tpu.matmul %4, %5, %cst {dimension_numbers = #tpu.dot_dimension_numbers<[1], [0], [0], [1], [0, 0, 1, 1], [], []>} : vector<16x32xf32>, vector<32x64xf32>, vector<16x64xf32> -> vector<16x64xf32>
    %7 = arith.addf %3, %6 : vector<16x64xf32>
    %c0_6 = arith.constant 0 : index
    %c0_7 = arith.constant 0 : index
    %8 = vector.load %arg7[%c0_6, %c0_7] : memref<16x64xf32, #tpu.memory_space<vmem>>, vector<16x64xf32>
    tpu.vector_store %arg7[%c0_6, %c0_7], %7 {strides = array<i32>} : memref<16x64xf32, #tpu.memory_space<vmem>>, vector<16x64xf32>,
    %c0_i32_8 = arith.constant 0 : i32
    %9 = arith.cmpi eq, %arg2, %c0_i32_8 : i32
    %10 = arith.extui %9 : i1 to i32
    %c0_i32_9 = arith.constant 0 : i32
    %11 = arith.cmpi ne, %10, %c0_i32_9 : i32
    scf.if %11 {
      %c0_10 = arith.constant 0 : index
      %c0_11 = arith.constant 0 : index
      %12 = vector.load %arg7[%c0_10, %c0_11] : memref<16x64xf32, #tpu.memory_space<vmem>>, vector<16x64xf32>
      %c0_12 = arith.constant 0 : index
      %c0_13 = arith.constant 0 : index
      %13 = vector.load %arg5[%c0_12, %c0_13] : memref<1x64xf32, #tpu.memory_space<vmem>>, vector<1x64xf32>
      %14 = vector.broadcast %13 : vector<1x64xf32> to vector<16x64xf32>
      %15 = arith.addf %12, %14 : vector<16x64xf32>
      %c0_14 = arith.constant 0 : index
      %c0_15 = arith.constant 0 : index
      %16 = vector.load %arg6[%c0_14, %c0_15] : memref<16x64xf32, #tpu.memory_space<vmem>>, vector<16x64xf32>
      tpu.vector_store %arg6[%c0_14, %c0_15], %15 {strides = array<i32>} : memref<16x64xf32, #tpu.memory_space<vmem>>, vector<16x64xf32>,
    } else {
    }
    return
  }
  func.func @transform_0(%arg0: i32, %arg1: i32, %arg2: i32) -> (i32, i32) {
    %c0_i32 = arith.constant 0 : i32
    return %arg0, %arg2 : i32, i32
  }
  func.func @transform_1(%arg0: i32, %arg1: i32, %arg2: i32) -> (i32, i32) {
    %c0_i32 = arith.constant 0 : i32
    return %arg2, %arg1 : i32, i32
  }
  func.func @transform_2(%arg0: i32, %arg1: i32, %arg2: i32) -> (i32, i32) {
    %c0_i32 = arith.constant 0 : i32
    %c0_i32_0 = arith.constant 0 : i32
    return %c0_i32, %arg1 : i32, i32
  }
  func.func @transform_3(%arg0: i32, %arg1: i32, %arg2: i32) -> (i32, i32) {
    %c0_i32 = arith.constant 0 : i32
    return %arg0, %arg1 : i32, i32
  }
}

module attributes {stable_mosaic.version = 11 : i64} {
  func.func @_lstm_recurrent_kernel(%arg0: i32, %arg1: memref<8x2x128xf32, #tpu.memory_space<vmem>>, %arg2: memref<32x128xf32, #tpu.memory_space<vmem>>, %arg3: memref<2x32xf32, #tpu.memory_space<vmem>>, %arg4: memref<2x32xf32, #tpu.memory_space<vmem>>, %arg5: memref<8x2x32xf32, #tpu.memory_space<vmem>>, %arg6: memref<2x32xf32, #tpu.memory_space<vmem>>, %arg7: memref<2x32xf32, #tpu.memory_space<vmem>>, %arg8: memref<2x32xf32, #tpu.memory_space<vmem>>, %arg9: memref<2x32xf32, #tpu.memory_space<vmem>>) attributes {dimension_semantics = [#tpu.dimension_semantics<arbitrary>], iteration_bounds = array<i64: 1>, scalar_prefetch = 0 : i64, scratch_operands = 2 : i64, tpu.core_type = #tpu.core_type<tc>, window_params = [{transform_indices = @transform_0, window_bounds = array<i64: 8, 2, 128>}, {pipeline_mode = #tpu.pipeline_mode<synchronous>, transform_indices = @transform_1, window_bounds = array<i64: 32, 128>}, {pipeline_mode = #tpu.pipeline_mode<synchronous>, transform_indices = @transform_2, window_bounds = array<i64: 2, 32>}, {pipeline_mode = #tpu.pipeline_mode<synchronous>, transform_indices = @transform_3, window_bounds = array<i64: 2, 32>}, {transform_indices = @transform_4, window_bounds = array<i64: 8, 2, 32>}, {pipeline_mode = #tpu.pipeline_mode<synchronous>, transform_indices = @transform_5, window_bounds = array<i64: 2, 32>}, {pipeline_mode = #tpu.pipeline_mode<synchronous>, transform_indices = @transform_6, window_bounds = array<i64: 2, 32>}]} {
    %c0_i32 = arith.constant 0 : i32
    %0 = arith.cmpi eq, %arg0, %c0_i32 : i32
    %1 = arith.extui %0 : i1 to i32
    %c0_i32_0 = arith.constant 0 : i32
    %2 = arith.cmpi ne, %1, %c0_i32_0 : i32
    scf.if %2 {
      %c0_152 = arith.constant 0 : index
      %c0_153 = arith.constant 0 : index
      %319 = vector.load %arg3[%c0_152, %c0_153] : memref<2x32xf32, #tpu.memory_space<vmem>>, vector<2x32xf32>
      %c0_154 = arith.constant 0 : index
      %c0_155 = arith.constant 0 : index
      %320 = vector.load %arg8[%c0_154, %c0_155] : memref<2x32xf32, #tpu.memory_space<vmem>>, vector<2x32xf32>
      tpu.vector_store %arg8[%c0_154, %c0_155], %319 {strides = array<i32>} : memref<2x32xf32, #tpu.memory_space<vmem>>, vector<2x32xf32>,
      %c0_156 = arith.constant 0 : index
      %c0_157 = arith.constant 0 : index
      %321 = vector.load %arg4[%c0_156, %c0_157] : memref<2x32xf32, #tpu.memory_space<vmem>>, vector<2x32xf32>
      %c0_158 = arith.constant 0 : index
      %c0_159 = arith.constant 0 : index
      %322 = vector.load %arg9[%c0_158, %c0_159] : memref<2x32xf32, #tpu.memory_space<vmem>>, vector<2x32xf32>
      tpu.vector_store %arg9[%c0_158, %c0_159], %321 {strides = array<i32>} : memref<2x32xf32, #tpu.memory_space<vmem>>, vector<2x32xf32>,
    } else {
    }
    %c0_i32_1 = arith.constant 0 : i32
    %c0 = arith.constant 0 : index
    %c0_2 = arith.constant 0 : index
    %3 = vector.load %arg8[%c0, %c0_2] : memref<2x32xf32, #tpu.memory_space<vmem>>, vector<2x32xf32>
    %c0_3 = arith.constant 0 : index
    %c0_4 = arith.constant 0 : index
    %4 = vector.load %arg2[%c0_3, %c0_4] : memref<32x128xf32, #tpu.memory_space<vmem>>, vector<32x128xf32>
    %cst = arith.constant dense<0.000000e+00> : vector<2x128xf32>
    %5 = tpu.matmul %3, %4, %cst {dimension_numbers = #tpu.dot_dimension_numbers<[1], [0], [0], [1], [0, 0, 1, 1], [], []>} : vector<2x32xf32>, vector<32x128xf32>, vector<2x128xf32> -> vector<2x128xf32>
    %6 = arith.index_cast %c0_i32_1 : i32 to index
    %c0_5 = arith.constant 0 : index
    %c0_6 = arith.constant 0 : index
    %7 = vector.load %arg1[%6, %c0_5, %c0_6] : memref<8x2x128xf32, #tpu.memory_space<vmem>>, vector<1x2x128xf32>
    %8 = vector.shape_cast %7 : vector<1x2x128xf32> to vector<2x128xf32>
    %9 = arith.addf %5, %8 : vector<2x128xf32>
    %10 = vector.extract_strided_slice %9 {offsets = [0, 0], sizes = [2, 32], strides = [1, 1]} : vector<2x128xf32> to vector<2x32xf32>
    %11 = arith.negf %10 : vector<2x32xf32>
    %12 = math.exp %11 : vector<2x32xf32>
    %cst_7 = arith.constant 1.000000e+00 : f32
    %13 = vector.broadcast %cst_7 : f32 to vector<2x32xf32>
    %14 = arith.addf %13, %12 : vector<2x32xf32>
    %15 = arith.divf %13, %14 : vector<2x32xf32>
    %16 = vector.extract_strided_slice %9 {offsets = [0, 32], sizes = [2, 32], strides = [1, 1]} : vector<2x128xf32> to vector<2x32xf32>
    %17 = arith.negf %16 : vector<2x32xf32>
    %18 = math.exp %17 : vector<2x32xf32>
    %cst_8 = arith.constant 1.000000e+00 : f32
    %19 = vector.broadcast %cst_8 : f32 to vector<2x32xf32>
    %20 = arith.addf %19, %18 : vector<2x32xf32>
    %21 = arith.divf %19, %20 : vector<2x32xf32>
    %22 = vector.extract_strided_slice %9 {offsets = [0, 64], sizes = [2, 32], strides = [1, 1]} : vector<2x128xf32> to vector<2x32xf32>
    %23 = math.tanh %22 : vector<2x32xf32>
    %24 = vector.extract_strided_slice %9 {offsets = [0, 96], sizes = [2, 32], strides = [1, 1]} : vector<2x128xf32> to vector<2x32xf32>
    %25 = arith.negf %24 : vector<2x32xf32>
    %26 = math.exp %25 : vector<2x32xf32>
    %cst_9 = arith.constant 1.000000e+00 : f32
    %27 = vector.broadcast %cst_9 : f32 to vector<2x32xf32>
    %28 = arith.addf %27, %26 : vector<2x32xf32>
    %29 = arith.divf %27, %28 : vector<2x32xf32>
    %c0_10 = arith.constant 0 : index
    %c0_11 = arith.constant 0 : index
    %30 = vector.load %arg9[%c0_10, %c0_11] : memref<2x32xf32, #tpu.memory_space<vmem>>, vector<2x32xf32>
    %31 = arith.mulf %21, %30 : vector<2x32xf32>
    %32 = arith.mulf %15, %23 : vector<2x32xf32>
    %33 = arith.addf %31, %32 : vector<2x32xf32>
    %34 = math.tanh %33 : vector<2x32xf32>
    %35 = arith.mulf %29, %34 : vector<2x32xf32>
    %c0_12 = arith.constant 0 : index
    %c0_13 = arith.constant 0 : index
    %36 = vector.load %arg8[%c0_12, %c0_13] : memref<2x32xf32, #tpu.memory_space<vmem>>, vector<2x32xf32>
    tpu.vector_store %arg8[%c0_12, %c0_13], %35 {strides = array<i32>} : memref<2x32xf32, #tpu.memory_space<vmem>>, vector<2x32xf32>,
    %c0_14 = arith.constant 0 : index
    %c0_15 = arith.constant 0 : index
    %37 = vector.load %arg9[%c0_14, %c0_15] : memref<2x32xf32, #tpu.memory_space<vmem>>, vector<2x32xf32>
    tpu.vector_store %arg9[%c0_14, %c0_15], %33 {strides = array<i32>} : memref<2x32xf32, #tpu.memory_space<vmem>>, vector<2x32xf32>,
    %38 = arith.index_cast %c0_i32_1 : i32 to index
    %c0_16 = arith.constant 0 : index
    %c0_17 = arith.constant 0 : index
    %39 = vector.load %arg5[%38, %c0_16, %c0_17] : memref<8x2x32xf32, #tpu.memory_space<vmem>>, vector<1x2x32xf32>
    %40 = vector.shape_cast %39 : vector<1x2x32xf32> to vector<2x32xf32>
    %41 = vector.shape_cast %35 : vector<2x32xf32> to vector<1x2x32xf32>
    tpu.vector_store %arg5[%38, %c0_16, %c0_17], %41 {strides = array<i32>} : memref<8x2x32xf32, #tpu.memory_space<vmem>>, vector<1x2x32xf32>,
    %c1_i32 = arith.constant 1 : i32
    %c0_18 = arith.constant 0 : index
    %c0_19 = arith.constant 0 : index
    %42 = vector.load %arg8[%c0_18, %c0_19] : memref<2x32xf32, #tpu.memory_space<vmem>>, vector<2x32xf32>
    %c0_20 = arith.constant 0 : index
    %c0_21 = arith.constant 0 : index
    %43 = vector.load %arg2[%c0_20, %c0_21] : memref<32x128xf32, #tpu.memory_space<vmem>>, vector<32x128xf32>
    %cst_22 = arith.constant dense<0.000000e+00> : vector<2x128xf32>
    %44 = tpu.matmul %42, %43, %cst_22 {dimension_numbers = #tpu.dot_dimension_numbers<[1], [0], [0], [1], [0, 0, 1, 1], [], []>} : vector<2x32xf32>, vector<32x128xf32>, vector<2x128xf32> -> vector<2x128xf32>
    %45 = arith.index_cast %c1_i32 : i32 to index
    %c0_23 = arith.constant 0 : index
    %c0_24 = arith.constant 0 : index
    %46 = vector.load %arg1[%45, %c0_23, %c0_24] : memref<8x2x128xf32, #tpu.memory_space<vmem>>, vector<1x2x128xf32>
    %47 = vector.shape_cast %46 : vector<1x2x128xf32> to vector<2x128xf32>
    %48 = arith.addf %44, %47 : vector<2x128xf32>
    %49 = vector.extract_strided_slice %48 {offsets = [0, 0], sizes = [2, 32], strides = [1, 1]} : vector<2x128xf32> to vector<2x32xf32>
    %50 = arith.negf %49 : vector<2x32xf32>
    %51 = math.exp %50 : vector<2x32xf32>
    %cst_25 = arith.constant 1.000000e+00 : f32
    %52 = vector.broadcast %cst_25 : f32 to vector<2x32xf32>
    %53 = arith.addf %52, %51 : vector<2x32xf32>
    %54 = arith.divf %52, %53 : vector<2x32xf32>
    %55 = vector.extract_strided_slice %48 {offsets = [0, 32], sizes = [2, 32], strides = [1, 1]} : vector<2x128xf32> to vector<2x32xf32>
    %56 = arith.negf %55 : vector<2x32xf32>
    %57 = math.exp %56 : vector<2x32xf32>
    %cst_26 = arith.constant 1.000000e+00 : f32
    %58 = vector.broadcast %cst_26 : f32 to vector<2x32xf32>
    %59 = arith.addf %58, %57 : vector<2x32xf32>
    %60 = arith.divf %58, %59 : vector<2x32xf32>
    %61 = vector.extract_strided_slice %48 {offsets = [0, 64], sizes = [2, 32], strides = [1, 1]} : vector<2x128xf32> to vector<2x32xf32>
    %62 = math.tanh %61 : vector<2x32xf32>
    %63 = vector.extract_strided_slice %48 {offsets = [0, 96], sizes = [2, 32], strides = [1, 1]} : vector<2x128xf32> to vector<2x32xf32>
    %64 = arith.negf %63 : vector<2x32xf32>
    %65 = math.exp %64 : vector<2x32xf32>
    %cst_27 = arith.constant 1.000000e+00 : f32
    %66 = vector.broadcast %cst_27 : f32 to vector<2x32xf32>
    %67 = arith.addf %66, %65 : vector<2x32xf32>
    %68 = arith.divf %66, %67 : vector<2x32xf32>
    %c0_28 = arith.constant 0 : index
    %c0_29 = arith.constant 0 : index
    %69 = vector.load %arg9[%c0_28, %c0_29] : memref<2x32xf32, #tpu.memory_space<vmem>>, vector<2x32xf32>
    %70 = arith.mulf %60, %69 : vector<2x32xf32>
    %71 = arith.mulf %54, %62 : vector<2x32xf32>
    %72 = arith.addf %70, %71 : vector<2x32xf32>
    %73 = math.tanh %72 : vector<2x32xf32>
    %74 = arith.mulf %68, %73 : vector<2x32xf32>
    %c0_30 = arith.constant 0 : index
    %c0_31 = arith.constant 0 : index
    %75 = vector.load %arg8[%c0_30, %c0_31] : memref<2x32xf32, #tpu.memory_space<vmem>>, vector<2x32xf32>
    tpu.vector_store %arg8[%c0_30, %c0_31], %74 {strides = array<i32>} : memref<2x32xf32, #tpu.memory_space<vmem>>, vector<2x32xf32>,
    %c0_32 = arith.constant 0 : index
    %c0_33 = arith.constant 0 : index
    %76 = vector.load %arg9[%c0_32, %c0_33] : memref<2x32xf32, #tpu.memory_space<vmem>>, vector<2x32xf32>
    tpu.vector_store %arg9[%c0_32, %c0_33], %72 {strides = array<i32>} : memref<2x32xf32, #tpu.memory_space<vmem>>, vector<2x32xf32>,
    %77 = arith.index_cast %c1_i32 : i32 to index
    %c0_34 = arith.constant 0 : index
    %c0_35 = arith.constant 0 : index
    %78 = vector.load %arg5[%77, %c0_34, %c0_35] : memref<8x2x32xf32, #tpu.memory_space<vmem>>, vector<1x2x32xf32>
    %79 = vector.shape_cast %78 : vector<1x2x32xf32> to vector<2x32xf32>
    %80 = vector.shape_cast %74 : vector<2x32xf32> to vector<1x2x32xf32>
    tpu.vector_store %arg5[%77, %c0_34, %c0_35], %80 {strides = array<i32>} : memref<8x2x32xf32, #tpu.memory_space<vmem>>, vector<1x2x32xf32>,
    %c2_i32 = arith.constant 2 : i32
    %c0_36 = arith.constant 0 : index
    %c0_37 = arith.constant 0 : index
    %81 = vector.load %arg8[%c0_36, %c0_37] : memref<2x32xf32, #tpu.memory_space<vmem>>, vector<2x32xf32>
    %c0_38 = arith.constant 0 : index
    %c0_39 = arith.constant 0 : index
    %82 = vector.load %arg2[%c0_38, %c0_39] : memref<32x128xf32, #tpu.memory_space<vmem>>, vector<32x128xf32>
    %cst_40 = arith.constant dense<0.000000e+00> : vector<2x128xf32>
    %83 = tpu.matmul %81, %82, %cst_40 {dimension_numbers = #tpu.dot_dimension_numbers<[1], [0], [0], [1], [0, 0, 1, 1], [], []>} : vector<2x32xf32>, vector<32x128xf32>, vector<2x128xf32> -> vector<2x128xf32>
    %84 = arith.index_cast %c2_i32 : i32 to index
    %c0_41 = arith.constant 0 : index
    %c0_42 = arith.constant 0 : index
    %85 = vector.load %arg1[%84, %c0_41, %c0_42] : memref<8x2x128xf32, #tpu.memory_space<vmem>>, vector<1x2x128xf32>
    %86 = vector.shape_cast %85 : vector<1x2x128xf32> to vector<2x128xf32>
    %87 = arith.addf %83, %86 : vector<2x128xf32>
    %88 = vector.extract_strided_slice %87 {offsets = [0, 0], sizes = [2, 32], strides = [1, 1]} : vector<2x128xf32> to vector<2x32xf32>
    %89 = arith.negf %88 : vector<2x32xf32>
    %90 = math.exp %89 : vector<2x32xf32>
    %cst_43 = arith.constant 1.000000e+00 : f32
    %91 = vector.broadcast %cst_43 : f32 to vector<2x32xf32>
    %92 = arith.addf %91, %90 : vector<2x32xf32>
    %93 = arith.divf %91, %92 : vector<2x32xf32>
    %94 = vector.extract_strided_slice %87 {offsets = [0, 32], sizes = [2, 32], strides = [1, 1]} : vector<2x128xf32> to vector<2x32xf32>
    %95 = arith.negf %94 : vector<2x32xf32>
    %96 = math.exp %95 : vector<2x32xf32>
    %cst_44 = arith.constant 1.000000e+00 : f32
    %97 = vector.broadcast %cst_44 : f32 to vector<2x32xf32>
    %98 = arith.addf %97, %96 : vector<2x32xf32>
    %99 = arith.divf %97, %98 : vector<2x32xf32>
    %100 = vector.extract_strided_slice %87 {offsets = [0, 64], sizes = [2, 32], strides = [1, 1]} : vector<2x128xf32> to vector<2x32xf32>
    %101 = math.tanh %100 : vector<2x32xf32>
    %102 = vector.extract_strided_slice %87 {offsets = [0, 96], sizes = [2, 32], strides = [1, 1]} : vector<2x128xf32> to vector<2x32xf32>
    %103 = arith.negf %102 : vector<2x32xf32>
    %104 = math.exp %103 : vector<2x32xf32>
    %cst_45 = arith.constant 1.000000e+00 : f32
    %105 = vector.broadcast %cst_45 : f32 to vector<2x32xf32>
    %106 = arith.addf %105, %104 : vector<2x32xf32>
    %107 = arith.divf %105, %106 : vector<2x32xf32>
    %c0_46 = arith.constant 0 : index
    %c0_47 = arith.constant 0 : index
    %108 = vector.load %arg9[%c0_46, %c0_47] : memref<2x32xf32, #tpu.memory_space<vmem>>, vector<2x32xf32>
    %109 = arith.mulf %99, %108 : vector<2x32xf32>
    %110 = arith.mulf %93, %101 : vector<2x32xf32>
    %111 = arith.addf %109, %110 : vector<2x32xf32>
    %112 = math.tanh %111 : vector<2x32xf32>
    %113 = arith.mulf %107, %112 : vector<2x32xf32>
    %c0_48 = arith.constant 0 : index
    %c0_49 = arith.constant 0 : index
    %114 = vector.load %arg8[%c0_48, %c0_49] : memref<2x32xf32, #tpu.memory_space<vmem>>, vector<2x32xf32>
    tpu.vector_store %arg8[%c0_48, %c0_49], %113 {strides = array<i32>} : memref<2x32xf32, #tpu.memory_space<vmem>>, vector<2x32xf32>,
    %c0_50 = arith.constant 0 : index
    %c0_51 = arith.constant 0 : index
    %115 = vector.load %arg9[%c0_50, %c0_51] : memref<2x32xf32, #tpu.memory_space<vmem>>, vector<2x32xf32>
    tpu.vector_store %arg9[%c0_50, %c0_51], %111 {strides = array<i32>} : memref<2x32xf32, #tpu.memory_space<vmem>>, vector<2x32xf32>,
    %116 = arith.index_cast %c2_i32 : i32 to index
    %c0_52 = arith.constant 0 : index
    %c0_53 = arith.constant 0 : index
    %117 = vector.load %arg5[%116, %c0_52, %c0_53] : memref<8x2x32xf32, #tpu.memory_space<vmem>>, vector<1x2x32xf32>
    %118 = vector.shape_cast %117 : vector<1x2x32xf32> to vector<2x32xf32>
    %119 = vector.shape_cast %113 : vector<2x32xf32> to vector<1x2x32xf32>
    tpu.vector_store %arg5[%116, %c0_52, %c0_53], %119 {strides = array<i32>} : memref<8x2x32xf32, #tpu.memory_space<vmem>>, vector<1x2x32xf32>,
    %c3_i32 = arith.constant 3 : i32
    %c0_54 = arith.constant 0 : index
    %c0_55 = arith.constant 0 : index
    %120 = vector.load %arg8[%c0_54, %c0_55] : memref<2x32xf32, #tpu.memory_space<vmem>>, vector<2x32xf32>
    %c0_56 = arith.constant 0 : index
    %c0_57 = arith.constant 0 : index
    %121 = vector.load %arg2[%c0_56, %c0_57] : memref<32x128xf32, #tpu.memory_space<vmem>>, vector<32x128xf32>
    %cst_58 = arith.constant dense<0.000000e+00> : vector<2x128xf32>
    %122 = tpu.matmul %120, %121, %cst_58 {dimension_numbers = #tpu.dot_dimension_numbers<[1], [0], [0], [1], [0, 0, 1, 1], [], []>} : vector<2x32xf32>, vector<32x128xf32>, vector<2x128xf32> -> vector<2x128xf32>
    %123 = arith.index_cast %c3_i32 : i32 to index
    %c0_59 = arith.constant 0 : index
    %c0_60 = arith.constant 0 : index
    %124 = vector.load %arg1[%123, %c0_59, %c0_60] : memref<8x2x128xf32, #tpu.memory_space<vmem>>, vector<1x2x128xf32>
    %125 = vector.shape_cast %124 : vector<1x2x128xf32> to vector<2x128xf32>
    %126 = arith.addf %122, %125 : vector<2x128xf32>
    %127 = vector.extract_strided_slice %126 {offsets = [0, 0], sizes = [2, 32], strides = [1, 1]} : vector<2x128xf32> to vector<2x32xf32>
    %128 = arith.negf %127 : vector<2x32xf32>
    %129 = math.exp %128 : vector<2x32xf32>
    %cst_61 = arith.constant 1.000000e+00 : f32
    %130 = vector.broadcast %cst_61 : f32 to vector<2x32xf32>
    %131 = arith.addf %130, %129 : vector<2x32xf32>
    %132 = arith.divf %130, %131 : vector<2x32xf32>
    %133 = vector.extract_strided_slice %126 {offsets = [0, 32], sizes = [2, 32], strides = [1, 1]} : vector<2x128xf32> to vector<2x32xf32>
    %134 = arith.negf %133 : vector<2x32xf32>
    %135 = math.exp %134 : vector<2x32xf32>
    %cst_62 = arith.constant 1.000000e+00 : f32
    %136 = vector.broadcast %cst_62 : f32 to vector<2x32xf32>
    %137 = arith.addf %136, %135 : vector<2x32xf32>
    %138 = arith.divf %136, %137 : vector<2x32xf32>
    %139 = vector.extract_strided_slice %126 {offsets = [0, 64], sizes = [2, 32], strides = [1, 1]} : vector<2x128xf32> to vector<2x32xf32>
    %140 = math.tanh %139 : vector<2x32xf32>
    %141 = vector.extract_strided_slice %126 {offsets = [0, 96], sizes = [2, 32], strides = [1, 1]} : vector<2x128xf32> to vector<2x32xf32>
    %142 = arith.negf %141 : vector<2x32xf32>
    %143 = math.exp %142 : vector<2x32xf32>
    %cst_63 = arith.constant 1.000000e+00 : f32
    %144 = vector.broadcast %cst_63 : f32 to vector<2x32xf32>
    %145 = arith.addf %144, %143 : vector<2x32xf32>
    %146 = arith.divf %144, %145 : vector<2x32xf32>
    %c0_64 = arith.constant 0 : index
    %c0_65 = arith.constant 0 : index
    %147 = vector.load %arg9[%c0_64, %c0_65] : memref<2x32xf32, #tpu.memory_space<vmem>>, vector<2x32xf32>
    %148 = arith.mulf %138, %147 : vector<2x32xf32>
    %149 = arith.mulf %132, %140 : vector<2x32xf32>
    %150 = arith.addf %148, %149 : vector<2x32xf32>
    %151 = math.tanh %150 : vector<2x32xf32>
    %152 = arith.mulf %146, %151 : vector<2x32xf32>
    %c0_66 = arith.constant 0 : index
    %c0_67 = arith.constant 0 : index
    %153 = vector.load %arg8[%c0_66, %c0_67] : memref<2x32xf32, #tpu.memory_space<vmem>>, vector<2x32xf32>
    tpu.vector_store %arg8[%c0_66, %c0_67], %152 {strides = array<i32>} : memref<2x32xf32, #tpu.memory_space<vmem>>, vector<2x32xf32>,
    %c0_68 = arith.constant 0 : index
    %c0_69 = arith.constant 0 : index
    %154 = vector.load %arg9[%c0_68, %c0_69] : memref<2x32xf32, #tpu.memory_space<vmem>>, vector<2x32xf32>
    tpu.vector_store %arg9[%c0_68, %c0_69], %150 {strides = array<i32>} : memref<2x32xf32, #tpu.memory_space<vmem>>, vector<2x32xf32>,
    %155 = arith.index_cast %c3_i32 : i32 to index
    %c0_70 = arith.constant 0 : index
    %c0_71 = arith.constant 0 : index
    %156 = vector.load %arg5[%155, %c0_70, %c0_71] : memref<8x2x32xf32, #tpu.memory_space<vmem>>, vector<1x2x32xf32>
    %157 = vector.shape_cast %156 : vector<1x2x32xf32> to vector<2x32xf32>
    %158 = vector.shape_cast %152 : vector<2x32xf32> to vector<1x2x32xf32>
    tpu.vector_store %arg5[%155, %c0_70, %c0_71], %158 {strides = array<i32>} : memref<8x2x32xf32, #tpu.memory_space<vmem>>, vector<1x2x32xf32>,
    %c4_i32 = arith.constant 4 : i32
    %c0_72 = arith.constant 0 : index
    %c0_73 = arith.constant 0 : index
    %159 = vector.load %arg8[%c0_72, %c0_73] : memref<2x32xf32, #tpu.memory_space<vmem>>, vector<2x32xf32>
    %c0_74 = arith.constant 0 : index
    %c0_75 = arith.constant 0 : index
    %160 = vector.load %arg2[%c0_74, %c0_75] : memref<32x128xf32, #tpu.memory_space<vmem>>, vector<32x128xf32>
    %cst_76 = arith.constant dense<0.000000e+00> : vector<2x128xf32>
    %161 = tpu.matmul %159, %160, %cst_76 {dimension_numbers = #tpu.dot_dimension_numbers<[1], [0], [0], [1], [0, 0, 1, 1], [], []>} : vector<2x32xf32>, vector<32x128xf32>, vector<2x128xf32> -> vector<2x128xf32>
    %162 = arith.index_cast %c4_i32 : i32 to index
    %c0_77 = arith.constant 0 : index
    %c0_78 = arith.constant 0 : index
    %163 = vector.load %arg1[%162, %c0_77, %c0_78] : memref<8x2x128xf32, #tpu.memory_space<vmem>>, vector<1x2x128xf32>
    %164 = vector.shape_cast %163 : vector<1x2x128xf32> to vector<2x128xf32>
    %165 = arith.addf %161, %164 : vector<2x128xf32>
    %166 = vector.extract_strided_slice %165 {offsets = [0, 0], sizes = [2, 32], strides = [1, 1]} : vector<2x128xf32> to vector<2x32xf32>
    %167 = arith.negf %166 : vector<2x32xf32>
    %168 = math.exp %167 : vector<2x32xf32>
    %cst_79 = arith.constant 1.000000e+00 : f32
    %169 = vector.broadcast %cst_79 : f32 to vector<2x32xf32>
    %170 = arith.addf %169, %168 : vector<2x32xf32>
    %171 = arith.divf %169, %170 : vector<2x32xf32>
    %172 = vector.extract_strided_slice %165 {offsets = [0, 32], sizes = [2, 32], strides = [1, 1]} : vector<2x128xf32> to vector<2x32xf32>
    %173 = arith.negf %172 : vector<2x32xf32>
    %174 = math.exp %173 : vector<2x32xf32>
    %cst_80 = arith.constant 1.000000e+00 : f32
    %175 = vector.broadcast %cst_80 : f32 to vector<2x32xf32>
    %176 = arith.addf %175, %174 : vector<2x32xf32>
    %177 = arith.divf %175, %176 : vector<2x32xf32>
    %178 = vector.extract_strided_slice %165 {offsets = [0, 64], sizes = [2, 32], strides = [1, 1]} : vector<2x128xf32> to vector<2x32xf32>
    %179 = math.tanh %178 : vector<2x32xf32>
    %180 = vector.extract_strided_slice %165 {offsets = [0, 96], sizes = [2, 32], strides = [1, 1]} : vector<2x128xf32> to vector<2x32xf32>
    %181 = arith.negf %180 : vector<2x32xf32>
    %182 = math.exp %181 : vector<2x32xf32>
    %cst_81 = arith.constant 1.000000e+00 : f32
    %183 = vector.broadcast %cst_81 : f32 to vector<2x32xf32>
    %184 = arith.addf %183, %182 : vector<2x32xf32>
    %185 = arith.divf %183, %184 : vector<2x32xf32>
    %c0_82 = arith.constant 0 : index
    %c0_83 = arith.constant 0 : index
    %186 = vector.load %arg9[%c0_82, %c0_83] : memref<2x32xf32, #tpu.memory_space<vmem>>, vector<2x32xf32>
    %187 = arith.mulf %177, %186 : vector<2x32xf32>
    %188 = arith.mulf %171, %179 : vector<2x32xf32>
    %189 = arith.addf %187, %188 : vector<2x32xf32>
    %190 = math.tanh %189 : vector<2x32xf32>
    %191 = arith.mulf %185, %190 : vector<2x32xf32>
    %c0_84 = arith.constant 0 : index
    %c0_85 = arith.constant 0 : index
    %192 = vector.load %arg8[%c0_84, %c0_85] : memref<2x32xf32, #tpu.memory_space<vmem>>, vector<2x32xf32>
    tpu.vector_store %arg8[%c0_84, %c0_85], %191 {strides = array<i32>} : memref<2x32xf32, #tpu.memory_space<vmem>>, vector<2x32xf32>,
    %c0_86 = arith.constant 0 : index
    %c0_87 = arith.constant 0 : index
    %193 = vector.load %arg9[%c0_86, %c0_87] : memref<2x32xf32, #tpu.memory_space<vmem>>, vector<2x32xf32>
    tpu.vector_store %arg9[%c0_86, %c0_87], %189 {strides = array<i32>} : memref<2x32xf32, #tpu.memory_space<vmem>>, vector<2x32xf32>,
    %194 = arith.index_cast %c4_i32 : i32 to index
    %c0_88 = arith.constant 0 : index
    %c0_89 = arith.constant 0 : index
    %195 = vector.load %arg5[%194, %c0_88, %c0_89] : memref<8x2x32xf32, #tpu.memory_space<vmem>>, vector<1x2x32xf32>
    %196 = vector.shape_cast %195 : vector<1x2x32xf32> to vector<2x32xf32>
    %197 = vector.shape_cast %191 : vector<2x32xf32> to vector<1x2x32xf32>
    tpu.vector_store %arg5[%194, %c0_88, %c0_89], %197 {strides = array<i32>} : memref<8x2x32xf32, #tpu.memory_space<vmem>>, vector<1x2x32xf32>,
    %c5_i32 = arith.constant 5 : i32
    %c0_90 = arith.constant 0 : index
    %c0_91 = arith.constant 0 : index
    %198 = vector.load %arg8[%c0_90, %c0_91] : memref<2x32xf32, #tpu.memory_space<vmem>>, vector<2x32xf32>
    %c0_92 = arith.constant 0 : index
    %c0_93 = arith.constant 0 : index
    %199 = vector.load %arg2[%c0_92, %c0_93] : memref<32x128xf32, #tpu.memory_space<vmem>>, vector<32x128xf32>
    %cst_94 = arith.constant dense<0.000000e+00> : vector<2x128xf32>
    %200 = tpu.matmul %198, %199, %cst_94 {dimension_numbers = #tpu.dot_dimension_numbers<[1], [0], [0], [1], [0, 0, 1, 1], [], []>} : vector<2x32xf32>, vector<32x128xf32>, vector<2x128xf32> -> vector<2x128xf32>
    %201 = arith.index_cast %c5_i32 : i32 to index
    %c0_95 = arith.constant 0 : index
    %c0_96 = arith.constant 0 : index
    %202 = vector.load %arg1[%201, %c0_95, %c0_96] : memref<8x2x128xf32, #tpu.memory_space<vmem>>, vector<1x2x128xf32>
    %203 = vector.shape_cast %202 : vector<1x2x128xf32> to vector<2x128xf32>
    %204 = arith.addf %200, %203 : vector<2x128xf32>
    %205 = vector.extract_strided_slice %204 {offsets = [0, 0], sizes = [2, 32], strides = [1, 1]} : vector<2x128xf32> to vector<2x32xf32>
    %206 = arith.negf %205 : vector<2x32xf32>
    %207 = math.exp %206 : vector<2x32xf32>
    %cst_97 = arith.constant 1.000000e+00 : f32
    %208 = vector.broadcast %cst_97 : f32 to vector<2x32xf32>
    %209 = arith.addf %208, %207 : vector<2x32xf32>
    %210 = arith.divf %208, %209 : vector<2x32xf32>
    %211 = vector.extract_strided_slice %204 {offsets = [0, 32], sizes = [2, 32], strides = [1, 1]} : vector<2x128xf32> to vector<2x32xf32>
    %212 = arith.negf %211 : vector<2x32xf32>
    %213 = math.exp %212 : vector<2x32xf32>
    %cst_98 = arith.constant 1.000000e+00 : f32
    %214 = vector.broadcast %cst_98 : f32 to vector<2x32xf32>
    %215 = arith.addf %214, %213 : vector<2x32xf32>
    %216 = arith.divf %214, %215 : vector<2x32xf32>
    %217 = vector.extract_strided_slice %204 {offsets = [0, 64], sizes = [2, 32], strides = [1, 1]} : vector<2x128xf32> to vector<2x32xf32>
    %218 = math.tanh %217 : vector<2x32xf32>
    %219 = vector.extract_strided_slice %204 {offsets = [0, 96], sizes = [2, 32], strides = [1, 1]} : vector<2x128xf32> to vector<2x32xf32>
    %220 = arith.negf %219 : vector<2x32xf32>
    %221 = math.exp %220 : vector<2x32xf32>
    %cst_99 = arith.constant 1.000000e+00 : f32
    %222 = vector.broadcast %cst_99 : f32 to vector<2x32xf32>
    %223 = arith.addf %222, %221 : vector<2x32xf32>
    %224 = arith.divf %222, %223 : vector<2x32xf32>
    %c0_100 = arith.constant 0 : index
    %c0_101 = arith.constant 0 : index
    %225 = vector.load %arg9[%c0_100, %c0_101] : memref<2x32xf32, #tpu.memory_space<vmem>>, vector<2x32xf32>
    %226 = arith.mulf %216, %225 : vector<2x32xf32>
    %227 = arith.mulf %210, %218 : vector<2x32xf32>
    %228 = arith.addf %226, %227 : vector<2x32xf32>
    %229 = math.tanh %228 : vector<2x32xf32>
    %230 = arith.mulf %224, %229 : vector<2x32xf32>
    %c0_102 = arith.constant 0 : index
    %c0_103 = arith.constant 0 : index
    %231 = vector.load %arg8[%c0_102, %c0_103] : memref<2x32xf32, #tpu.memory_space<vmem>>, vector<2x32xf32>
    tpu.vector_store %arg8[%c0_102, %c0_103], %230 {strides = array<i32>} : memref<2x32xf32, #tpu.memory_space<vmem>>, vector<2x32xf32>,
    %c0_104 = arith.constant 0 : index
    %c0_105 = arith.constant 0 : index
    %232 = vector.load %arg9[%c0_104, %c0_105] : memref<2x32xf32, #tpu.memory_space<vmem>>, vector<2x32xf32>
    tpu.vector_store %arg9[%c0_104, %c0_105], %228 {strides = array<i32>} : memref<2x32xf32, #tpu.memory_space<vmem>>, vector<2x32xf32>,
    %233 = arith.index_cast %c5_i32 : i32 to index
    %c0_106 = arith.constant 0 : index
    %c0_107 = arith.constant 0 : index
    %234 = vector.load %arg5[%233, %c0_106, %c0_107] : memref<8x2x32xf32, #tpu.memory_space<vmem>>, vector<1x2x32xf32>
    %235 = vector.shape_cast %234 : vector<1x2x32xf32> to vector<2x32xf32>
    %236 = vector.shape_cast %230 : vector<2x32xf32> to vector<1x2x32xf32>
    tpu.vector_store %arg5[%233, %c0_106, %c0_107], %236 {strides = array<i32>} : memref<8x2x32xf32, #tpu.memory_space<vmem>>, vector<1x2x32xf32>,
    %c6_i32 = arith.constant 6 : i32
    %c0_108 = arith.constant 0 : index
    %c0_109 = arith.constant 0 : index
    %237 = vector.load %arg8[%c0_108, %c0_109] : memref<2x32xf32, #tpu.memory_space<vmem>>, vector<2x32xf32>
    %c0_110 = arith.constant 0 : index
    %c0_111 = arith.constant 0 : index
    %238 = vector.load %arg2[%c0_110, %c0_111] : memref<32x128xf32, #tpu.memory_space<vmem>>, vector<32x128xf32>
    %cst_112 = arith.constant dense<0.000000e+00> : vector<2x128xf32>
    %239 = tpu.matmul %237, %238, %cst_112 {dimension_numbers = #tpu.dot_dimension_numbers<[1], [0], [0], [1], [0, 0, 1, 1], [], []>} : vector<2x32xf32>, vector<32x128xf32>, vector<2x128xf32> -> vector<2x128xf32>
    %240 = arith.index_cast %c6_i32 : i32 to index
    %c0_113 = arith.constant 0 : index
    %c0_114 = arith.constant 0 : index
    %241 = vector.load %arg1[%240, %c0_113, %c0_114] : memref<8x2x128xf32, #tpu.memory_space<vmem>>, vector<1x2x128xf32>
    %242 = vector.shape_cast %241 : vector<1x2x128xf32> to vector<2x128xf32>
    %243 = arith.addf %239, %242 : vector<2x128xf32>
    %244 = vector.extract_strided_slice %243 {offsets = [0, 0], sizes = [2, 32], strides = [1, 1]} : vector<2x128xf32> to vector<2x32xf32>
    %245 = arith.negf %244 : vector<2x32xf32>
    %246 = math.exp %245 : vector<2x32xf32>
    %cst_115 = arith.constant 1.000000e+00 : f32
    %247 = vector.broadcast %cst_115 : f32 to vector<2x32xf32>
    %248 = arith.addf %247, %246 : vector<2x32xf32>
    %249 = arith.divf %247, %248 : vector<2x32xf32>
    %250 = vector.extract_strided_slice %243 {offsets = [0, 32], sizes = [2, 32], strides = [1, 1]} : vector<2x128xf32> to vector<2x32xf32>
    %251 = arith.negf %250 : vector<2x32xf32>
    %252 = math.exp %251 : vector<2x32xf32>
    %cst_116 = arith.constant 1.000000e+00 : f32
    %253 = vector.broadcast %cst_116 : f32 to vector<2x32xf32>
    %254 = arith.addf %253, %252 : vector<2x32xf32>
    %255 = arith.divf %253, %254 : vector<2x32xf32>
    %256 = vector.extract_strided_slice %243 {offsets = [0, 64], sizes = [2, 32], strides = [1, 1]} : vector<2x128xf32> to vector<2x32xf32>
    %257 = math.tanh %256 : vector<2x32xf32>
    %258 = vector.extract_strided_slice %243 {offsets = [0, 96], sizes = [2, 32], strides = [1, 1]} : vector<2x128xf32> to vector<2x32xf32>
    %259 = arith.negf %258 : vector<2x32xf32>
    %260 = math.exp %259 : vector<2x32xf32>
    %cst_117 = arith.constant 1.000000e+00 : f32
    %261 = vector.broadcast %cst_117 : f32 to vector<2x32xf32>
    %262 = arith.addf %261, %260 : vector<2x32xf32>
    %263 = arith.divf %261, %262 : vector<2x32xf32>
    %c0_118 = arith.constant 0 : index
    %c0_119 = arith.constant 0 : index
    %264 = vector.load %arg9[%c0_118, %c0_119] : memref<2x32xf32, #tpu.memory_space<vmem>>, vector<2x32xf32>
    %265 = arith.mulf %255, %264 : vector<2x32xf32>
    %266 = arith.mulf %249, %257 : vector<2x32xf32>
    %267 = arith.addf %265, %266 : vector<2x32xf32>
    %268 = math.tanh %267 : vector<2x32xf32>
    %269 = arith.mulf %263, %268 : vector<2x32xf32>
    %c0_120 = arith.constant 0 : index
    %c0_121 = arith.constant 0 : index
    %270 = vector.load %arg8[%c0_120, %c0_121] : memref<2x32xf32, #tpu.memory_space<vmem>>, vector<2x32xf32>
    tpu.vector_store %arg8[%c0_120, %c0_121], %269 {strides = array<i32>} : memref<2x32xf32, #tpu.memory_space<vmem>>, vector<2x32xf32>,
    %c0_122 = arith.constant 0 : index
    %c0_123 = arith.constant 0 : index
    %271 = vector.load %arg9[%c0_122, %c0_123] : memref<2x32xf32, #tpu.memory_space<vmem>>, vector<2x32xf32>
    tpu.vector_store %arg9[%c0_122, %c0_123], %267 {strides = array<i32>} : memref<2x32xf32, #tpu.memory_space<vmem>>, vector<2x32xf32>,
    %272 = arith.index_cast %c6_i32 : i32 to index
    %c0_124 = arith.constant 0 : index
    %c0_125 = arith.constant 0 : index
    %273 = vector.load %arg5[%272, %c0_124, %c0_125] : memref<8x2x32xf32, #tpu.memory_space<vmem>>, vector<1x2x32xf32>
    %274 = vector.shape_cast %273 : vector<1x2x32xf32> to vector<2x32xf32>
    %275 = vector.shape_cast %269 : vector<2x32xf32> to vector<1x2x32xf32>
    tpu.vector_store %arg5[%272, %c0_124, %c0_125], %275 {strides = array<i32>} : memref<8x2x32xf32, #tpu.memory_space<vmem>>, vector<1x2x32xf32>,
    %c7_i32 = arith.constant 7 : i32
    %c0_126 = arith.constant 0 : index
    %c0_127 = arith.constant 0 : index
    %276 = vector.load %arg8[%c0_126, %c0_127] : memref<2x32xf32, #tpu.memory_space<vmem>>, vector<2x32xf32>
    %c0_128 = arith.constant 0 : index
    %c0_129 = arith.constant 0 : index
    %277 = vector.load %arg2[%c0_128, %c0_129] : memref<32x128xf32, #tpu.memory_space<vmem>>, vector<32x128xf32>
    %cst_130 = arith.constant dense<0.000000e+00> : vector<2x128xf32>
    %278 = tpu.matmul %276, %277, %cst_130 {dimension_numbers = #tpu.dot_dimension_numbers<[1], [0], [0], [1], [0, 0, 1, 1], [], []>} : vector<2x32xf32>, vector<32x128xf32>, vector<2x128xf32> -> vector<2x128xf32>
    %279 = arith.index_cast %c7_i32 : i32 to index
    %c0_131 = arith.constant 0 : index
    %c0_132 = arith.constant 0 : index
    %280 = vector.load %arg1[%279, %c0_131, %c0_132] : memref<8x2x128xf32, #tpu.memory_space<vmem>>, vector<1x2x128xf32>
    %281 = vector.shape_cast %280 : vector<1x2x128xf32> to vector<2x128xf32>
    %282 = arith.addf %278, %281 : vector<2x128xf32>
    %283 = vector.extract_strided_slice %282 {offsets = [0, 0], sizes = [2, 32], strides = [1, 1]} : vector<2x128xf32> to vector<2x32xf32>
    %284 = arith.negf %283 : vector<2x32xf32>
    %285 = math.exp %284 : vector<2x32xf32>
    %cst_133 = arith.constant 1.000000e+00 : f32
    %286 = vector.broadcast %cst_133 : f32 to vector<2x32xf32>
    %287 = arith.addf %286, %285 : vector<2x32xf32>
    %288 = arith.divf %286, %287 : vector<2x32xf32>
    %289 = vector.extract_strided_slice %282 {offsets = [0, 32], sizes = [2, 32], strides = [1, 1]} : vector<2x128xf32> to vector<2x32xf32>
    %290 = arith.negf %289 : vector<2x32xf32>
    %291 = math.exp %290 : vector<2x32xf32>
    %cst_134 = arith.constant 1.000000e+00 : f32
    %292 = vector.broadcast %cst_134 : f32 to vector<2x32xf32>
    %293 = arith.addf %292, %291 : vector<2x32xf32>
    %294 = arith.divf %292, %293 : vector<2x32xf32>
    %295 = vector.extract_strided_slice %282 {offsets = [0, 64], sizes = [2, 32], strides = [1, 1]} : vector<2x128xf32> to vector<2x32xf32>
    %296 = math.tanh %295 : vector<2x32xf32>
    %297 = vector.extract_strided_slice %282 {offsets = [0, 96], sizes = [2, 32], strides = [1, 1]} : vector<2x128xf32> to vector<2x32xf32>
    %298 = arith.negf %297 : vector<2x32xf32>
    %299 = math.exp %298 : vector<2x32xf32>
    %cst_135 = arith.constant 1.000000e+00 : f32
    %300 = vector.broadcast %cst_135 : f32 to vector<2x32xf32>
    %301 = arith.addf %300, %299 : vector<2x32xf32>
    %302 = arith.divf %300, %301 : vector<2x32xf32>
    %c0_136 = arith.constant 0 : index
    %c0_137 = arith.constant 0 : index
    %303 = vector.load %arg9[%c0_136, %c0_137] : memref<2x32xf32, #tpu.memory_space<vmem>>, vector<2x32xf32>
    %304 = arith.mulf %294, %303 : vector<2x32xf32>
    %305 = arith.mulf %288, %296 : vector<2x32xf32>
    %306 = arith.addf %304, %305 : vector<2x32xf32>
    %307 = math.tanh %306 : vector<2x32xf32>
    %308 = arith.mulf %302, %307 : vector<2x32xf32>
    %c0_138 = arith.constant 0 : index
    %c0_139 = arith.constant 0 : index
    %309 = vector.load %arg8[%c0_138, %c0_139] : memref<2x32xf32, #tpu.memory_space<vmem>>, vector<2x32xf32>
    tpu.vector_store %arg8[%c0_138, %c0_139], %308 {strides = array<i32>} : memref<2x32xf32, #tpu.memory_space<vmem>>, vector<2x32xf32>,
    %c0_140 = arith.constant 0 : index
    %c0_141 = arith.constant 0 : index
    %310 = vector.load %arg9[%c0_140, %c0_141] : memref<2x32xf32, #tpu.memory_space<vmem>>, vector<2x32xf32>
    tpu.vector_store %arg9[%c0_140, %c0_141], %306 {strides = array<i32>} : memref<2x32xf32, #tpu.memory_space<vmem>>, vector<2x32xf32>,
    %311 = arith.index_cast %c7_i32 : i32 to index
    %c0_142 = arith.constant 0 : index
    %c0_143 = arith.constant 0 : index
    %312 = vector.load %arg5[%311, %c0_142, %c0_143] : memref<8x2x32xf32, #tpu.memory_space<vmem>>, vector<1x2x32xf32>
    %313 = vector.shape_cast %312 : vector<1x2x32xf32> to vector<2x32xf32>
    %314 = vector.shape_cast %308 : vector<2x32xf32> to vector<1x2x32xf32>
    tpu.vector_store %arg5[%311, %c0_142, %c0_143], %314 {strides = array<i32>} : memref<8x2x32xf32, #tpu.memory_space<vmem>>, vector<1x2x32xf32>,
    %c8_i32 = arith.constant 8 : i32
    %c0_144 = arith.constant 0 : index
    %c0_145 = arith.constant 0 : index
    %315 = vector.load %arg8[%c0_144, %c0_145] : memref<2x32xf32, #tpu.memory_space<vmem>>, vector<2x32xf32>
    %c0_146 = arith.constant 0 : index
    %c0_147 = arith.constant 0 : index
    %316 = vector.load %arg6[%c0_146, %c0_147] : memref<2x32xf32, #tpu.memory_space<vmem>>, vector<2x32xf32>
    tpu.vector_store %arg6[%c0_146, %c0_147], %315 {strides = array<i32>} : memref<2x32xf32, #tpu.memory_space<vmem>>, vector<2x32xf32>,
    %c0_148 = arith.constant 0 : index
    %c0_149 = arith.constant 0 : index
    %317 = vector.load %arg9[%c0_148, %c0_149] : memref<2x32xf32, #tpu.memory_space<vmem>>, vector<2x32xf32>
    %c0_150 = arith.constant 0 : index
    %c0_151 = arith.constant 0 : index
    %318 = vector.load %arg7[%c0_150, %c0_151] : memref<2x32xf32, #tpu.memory_space<vmem>>, vector<2x32xf32>
    tpu.vector_store %arg7[%c0_150, %c0_151], %317 {strides = array<i32>} : memref<2x32xf32, #tpu.memory_space<vmem>>, vector<2x32xf32>,
    return
  }
  func.func @transform_0(%arg0: i32) -> (i32, i32, i32) {
    %c0_i32 = arith.constant 0 : i32
    %c0_i32_0 = arith.constant 0 : i32
    %c0_i32_1 = arith.constant 0 : i32
    return %arg0, %c0_i32, %c0_i32_0 : i32, i32, i32
  }
  func.func @transform_1(%arg0: i32) -> (i32, i32) {
    %c0_i32 = arith.constant 0 : i32
    %c0_i32_0 = arith.constant 0 : i32
    %c0_i32_1 = arith.constant 0 : i32
    return %c0_i32, %c0_i32_0 : i32, i32
  }
  func.func @transform_2(%arg0: i32) -> (i32, i32) {
    %c0_i32 = arith.constant 0 : i32
    %c0_i32_0 = arith.constant 0 : i32
    %c0_i32_1 = arith.constant 0 : i32
    return %c0_i32, %c0_i32_0 : i32, i32
  }
  func.func @transform_3(%arg0: i32) -> (i32, i32) {
    %c0_i32 = arith.constant 0 : i32
    %c0_i32_0 = arith.constant 0 : i32
    %c0_i32_1 = arith.constant 0 : i32
    return %c0_i32, %c0_i32_0 : i32, i32
  }
  func.func @transform_4(%arg0: i32) -> (i32, i32, i32) {
    %c0_i32 = arith.constant 0 : i32
    %c0_i32_0 = arith.constant 0 : i32
    %c0_i32_1 = arith.constant 0 : i32
    return %arg0, %c0_i32, %c0_i32_0 : i32, i32, i32
  }
  func.func @transform_5(%arg0: i32) -> (i32, i32) {
    %c0_i32 = arith.constant 0 : i32
    %c0_i32_0 = arith.constant 0 : i32
    %c0_i32_1 = arith.constant 0 : i32
    return %c0_i32, %c0_i32_0 : i32, i32
  }
  func.func @transform_6(%arg0: i32) -> (i32, i32) {
    %c0_i32 = arith.constant 0 : i32
    %c0_i32_0 = arith.constant 0 : i32
    %c0_i32_1 = arith.constant 0 : i32
    return %c0_i32, %c0_i32_0 : i32, i32
  }
}

</mosaic_0001>

<bundles_post_ra>
// kernel: rnn_model_forward.9
= control target key start
LH: loop header
LB: loop body
LE: loop exit
PB: predicated region body
PF: predicated region fallthrough
CT: control target
= control target key end

     0   :  { %vm30_vm0 = vcmask 261120   ;;  %vm19_vm1 = vcmask 523264   ;;  %v205_v6 = vmov 0.0   ;;  %s270_s0 = inlined_call_operand.vmem [shape: f32[16,32], index: 0, kind: input, shape index: {}]   ;;  %s271_s1 = inlined_call_operand.vmem [shape: f32[32,64], index: 1, kind: input, shape index: {}]   ;;  %s272_s2 = inlined_call_operand.vmem [shape: f32[1,64], index: 2, kind: input, shape index: {}]   ;;  %s273_s3 = inlined_call_operand.hbm [shape: f32[16,64], index: 3, kind: output, shape index: {}]  }
   0x1   :  { %v26_v0 = vld [vmem:[%s271_s1] sm:$0xff]  ;;  %v27_v1 = vld [vmem:[%s271_s1 + $0x8] sm:$0xff]  ;;  %v28_v2 = vld [vmem:[%s271_s1 + $0x10] sm:$0xff]  ;;  %21 = vst.msk [vmem:[#allocation2 + $0x8] sm:$0xff] %vm19_vm1, %v205_v6 }
   0x2   :  { %v169_v3 = vpack.c.bf16 %v27_v1, %v26_v0  ;;  %v29_v4 = vld [vmem:[%s271_s1 + $0x18] sm:$0xff]  ;;  %v24_v5 = vld [vmem:[%s270_s0] sm:$0xff]  ;;  %20 = vst.msk [vmem:[#allocation2] sm:$0xff] %vm19_vm1, %v205_v6 }
   0x3   :  { %v173_v7 = vpack.c.bf16 %v29_v4, %v28_v2  ;;  %166 = vmatprep.mubr.msk.f32.mxu0 %vm30_vm0, %v24_v5 }
   0x4   :  { %8 = vsyncpa [#allocation4], 0  ;;  %170 = vmatprep.subr.bf16.mxu0 %v169_v3  ;;  %v25_v8 = vld [vmem:[%s270_s0 + $0x8] sm:$0xff]  ;;  %v151_v15 = vld [vmem:[%s272_s2] ss:$0 sm:$0xff]  ;;  %s206_s25 = smov [#allocation3]  }
   0x5   :  { %172 = vmatpush3.bf16.msra.mxu0 %v169_v3  ;;  %s138_s26 = sshll.u32 %s206_s25, 4  ;;  %s139_s26 = int_to_ptr.vmem [resolvable:$true] %s138_s26 }
   0x6   :  { %174 = vmatprep.subr.bf16.mxu0 %v173_v7  ;;  %s181_s0 = scalar_lea.vmem %s139_s26, 256  ;;  %p186_p1 = scmp.lt.s32.totalorder %s139_s26, %s139_s26 }
   0x7   :  { %p182_p0 = scmp.ne.s32.totalorder %s139_s26, %s181_s0  ;;  %p187_p2 = scmp.lt.s32.totalorder %s181_s0, %s181_s0 }
   0x8   :  { %v23_v9 = vld [vmem:[#allocation2 + $0x8] sm:$0xff] }
   0x9   :  { %176 = vmatpush3.bf16.msra.mxu0 %v173_v7  ;;  %v22_v10 = vld [vmem:[#allocation2] sm:$0xff]  ;;  %p188_p3 = por %p187_p2, %p186_p1 }
   0xb   :  { %p189_p4 = pnand %p188_p3, %p182_p0 }
   0xc   :  { %167 = vmatmul.mubr.msk.f32.vlgmr.msra.gmra.mrb[0].mxu0 %vm30_vm0, %v25_v8 }
  0xdf   :  { %v168_v11 = vpop.f32.mrb[0].mxu0 }
  0xe0   :  { %v113_v12 = vadd.f32 %v168_v11, %v23_v9  ;;  %v103_v13 = vpop.f32.mrb[1].mxu0 }
  0xe1   :  { %v112_v14 = vadd.f32 %v103_v13, %v22_v10 }
  0xe2   :  { %116 = vst.msk [vmem:[#allocation2 + $0x8] sm:$0xff] %vm19_vm1, %v113_v12 }
  0xe3   :  { %115 = vst.msk [vmem:[#allocation2] sm:$0xff] %vm19_vm1, %v112_v14 }
  0xe9   :  { %v121_v16 = vld [vmem:[#allocation2 + $0x8] sm:$0xff] }
  0xea   :  { %v120_v17 = vld [vmem:[#allocation2] sm:$0xff]  ;;  %v130_v18 = vadd.f32 %v151_v15, %v121_v16 }
  0xeb   :  { %v129_v19 = vadd.f32 %v151_v15, %v120_v17 }
  0xec   :  { %132 = vst.msk [vmem:[#allocation3 + $0x8] sm:$0xff] %vm19_vm1, %v130_v18 }
  0xed   :  { %131 = vst.msk [vmem:[#allocation3] sm:$0xff] %vm19_vm1, %v129_v19 }
  0xee   :  { %192 = shalt.err (!%p189_p4)
}
  0xef   :  { %s193_s28 = scalar_lea.hbm %s273_s3, 256 }
  0xf0   :  { %p194_p5 = scmp.ne.s32.totalorder %s273_s3, %s193_s28  ;;  %p197_p6 = scmp.lt.u32.totalorder %s193_s28, %s273_s3 }
  0xf2   :  { %p199_p7 = pnand %p197_p6, %p194_p5 }
  0xf4   :  { %202 = shalt.err (!%p199_p7)
}
  0xf5   :  { %s207_s6 = smov 128   ;;  %s208_s7 = smov 8  }
  0xf6   :  { %144 = dma.vmem_to_hbm [thread:$0]  %s139_s26, 256, %s273_s3, [#allocation4], %s207_s6, %s207_s6, %s208_s7  }
  0xf7   :  { %203 = dma.done.wait [#allocation4], 256  }
  0xf8   :  { %204 = vsyncadd [#allocation4], 4294967040 }
  0xf9   :  { %148 = vsyncpa [#allocation4], 1 }

// kernel: rnn_model_forward.5
= control target key start
LH: loop header
LB: loop body
LE: loop exit
PB: predicated region body
PF: predicated region fallthrough
CT: control target
= control target key end

     0   :  { %vm28_vm0 = vcmask 261120   ;;  %s209_s1 = inlined_call_operand.vmem [shape: f32[32,128], index: 1, kind: input, shape index: {}]   ;;  %s210_s0 = inlined_call_operand.vmem [shape: f32[16,32], index: 0, kind: input, shape index: {}]   ;;  %s211_s2 = inlined_call_operand.vmem [shape: f32[1,128], index: 2, kind: input, shape index: {}]   ;;  %s212_s3 = inlined_call_operand.vmem [shape: f32[16,128], index: 3, kind: output, shape index: {}]  }
   0x1   :  { %v24_v0 = vld [vmem:[%s209_s1] sm:$0xff]  ;;  %v25_v1 = vld [vmem:[%s209_s1 + $0x8] sm:$0xff]  ;;  %v26_v2 = vld [vmem:[%s209_s1 + $0x10] sm:$0xff] }
   0x2   :  { %v154_v3 = vpack.c.bf16 %v25_v1, %v24_v0  ;;  %v27_v4 = vld [vmem:[%s209_s1 + $0x18] sm:$0xff]  ;;  %v22_v5 = vld [vmem:[%s210_s0] sm:$0xff]  ;;  %v23_v7 = vld [vmem:[%s210_s0 + $0x8] sm:$0xff] }
   0x3   :  { %v158_v6 = vpack.c.bf16 %v27_v4, %v26_v2  ;;  %151 = vmatprep.mubr.msk.f32.mxu0 %vm28_vm0, %v22_v5  ;;  %v136_v8 = vld [vmem:[%s211_s2] ss:$0 sm:$0xff] }
   0x4   :  { %155 = vmatprep.subr.bf16.mxu0 %v154_v3 }
   0x5   :  { %157 = vmatpush3.bf16.msra.mxu0 %v154_v3 }
   0x6   :  { %159 = vmatprep.subr.bf16.mxu0 %v158_v6 }
   0x9   :  { %161 = vmatpush3.bf16.msra.mxu0 %v158_v6 }
   0xc   :  { %152 = vmatmul.mubr.msk.f32.vlgmr.msra.gmra.mrb[0].mxu0 %vm28_vm0, %v23_v7 }
  0xdf   :  { %v153_v9 = vpop.f32.mrb[0].mxu0 }
  0xe0   :  { %v127_v10 = vadd.f32 %v153_v9, %v136_v8  ;;  %v101_v11 = vpop.f32.mrb[1].mxu0 }
  0xe1   :  { %v126_v12 = vadd.f32 %v136_v8, %v101_v11 }
  0xe2   :  { %129 = vst [vmem:[%s212_s3 + $0x8] sm:$0xff] %v127_v10 }
  0xe3   :  { %128 = vst [vmem:[%s212_s3] sm:$0xff] %v126_v12 }

// kernel: rnn_model_forward.6
= control target key start
LH: loop header
LB: loop body
LE: loop exit
PB: predicated region body
PF: predicated region fallthrough
CT: control target
= control target key end

     0   :  { %vm25_vm0 = vcmask 254976   ;;  %v1289_v0 = vmov 0.0|0.0   ;;  %vm1290_vm1 = vmmov 0   ;;  %v1291_v4 = vmov 0.0   ;;  %s1292_s9 = smov 64   ;;  %s1293_s10 = smov 32   ;;  %s1538_s1 = inlined_call_operand.vmem [shape: f32[32,128], index: 1, kind: input, shape index: {}]   ;;  %s1539_s2 = inlined_call_operand.vmem [shape: f32[2,32], index: 2, kind: input, shape index: {}]   ;;  %s1540_s3 = inlined_call_operand.vmem [shape: f32[2,32], index: 3, kind: input, shape index: {}]   ;;  %s1541_s0 = inlined_call_operand.vmem [shape: f32[8,2,128], index: 0, kind: input, shape index: {}]   ;;  %s1542_s4 = inlined_call_operand.vmem [shape: f32[8,2,32], index: 4, kind: output, shape index: {0}]   ;;  %s1543_s6 = inlined_call_operand.vmem [shape: f32[2,32], index: 6, kind: output, shape index: {2}]   ;;  %s1544_s5 = inlined_call_operand.vmem [shape: f32[2,32], index: 5, kind: output, shape index: {1}]  }
   0x1   :  { %1171 = vmatprep.subr.bf16.mxu0 %v1289_v0  ;;  %v30_v1 = vld [vmem:[%s1538_s1] sm:$0xff]  ;;  %v31_v2 = vld [vmem:[%s1538_s1 + $0x8] sm:$0xff]  ;;  %v32_v3 = vld [vmem:[%s1538_s1 + $0x10] sm:$0xff]  ;;  %1091 = vmatprep.mubr.msk.f32.mxu0 %vm1290_vm1, %v1291_v4  ;;  %vm35_vm2 = vcmask 261120  }
   0x2   :  { %v1342_v5 = vpack.c.bf16 %v31_v2, %v30_v1  ;;  %v33_v6 = vld [vmem:[%s1538_s1 + $0x18] sm:$0xff]  ;;  %v24_v7 = vld [vmem:[%s1539_s2] sm:$0x3]  ;;  %1177 = vmatprep.subr.bf16.mxu1 %v1289_v0  ;;  %1102 = vmatprep.mubr.msk.f32.mxu1 %vm1290_vm1, %v1291_v4  ;;  %v1015_v34 = vld [vmem:[%s1541_s0 + $0x2] sm:$0x3] }
   0x3   :  { %26 = vst.msk [vmem:[#allocation2] sm:$0x3] %vm25_vm0, %v24_v7  ;;  %v1355_v8 = vpack.c.bf16 %v33_v6, %v32_v3  ;;  %v27_v10 = vld [vmem:[%s1540_s3] sm:$0x3]  ;;  %s1294_s3 = smov 96  }
   0x4   :  { %1173 = vmatpush3.bf16.msra.mxu0 %v1342_v5  ;;  %1179 = vmatpush3.bf16.msra.mxu1 %v1342_v5  ;;  %28 = vst.msk [vmem:[#allocation3] sm:$0x3] %vm25_vm0, %v27_v10  ;;  %v34_v11 = vld [vmem:[%s1541_s0] sm:$0x3]  ;;  %v1019_v56 = vld [vmem:[%s1541_s0 + $0x4] sm:$0x3] }
   0x5   :  { %1174 = vmatprep.subr.bf16.mxu0 %v1289_v0  ;;  %1180 = vmatprep.subr.bf16.mxu1 %v1289_v0 }
   0x8   :  { %1176 = vmatpush3.bf16.msra.mxu0 %v1355_v8  ;;  %1182 = vmatpush3.bf16.msra.mxu1 %v1355_v8 }
   0x9   :  { %1183 = vmatprep.subr.bf16.mxu0 %v1289_v0  ;;  %1189 = vmatprep.subr.bf16.mxu1 %v1289_v0 }
   0xa   :  { %v29_v9 = vld [vmem:[#allocation2] sm:$0x3] }
   0xb   :  { %1092 = vmatmul.mubr.msk.f32.vlgmr.msra.gmra.mrb[0].mxu0 %vm35_vm2, %v29_v9  ;;  %v116_v16 = vld [vmem:[#allocation3] sm:$0x3] }
   0xc   :  { %1185 = vmatpush3.bf16.msra.mxu0 %v1342_v5  ;;  %1113 = vmatprep.mubr.msk.f32.mxu0 %vm1290_vm1, %v1291_v4 }
   0xd   :  { %1186 = vmatprep.subr.bf16.mxu0 %v1289_v0 }
  0x10   :  { %1188 = vmatpush3.bf16.msra.mxu0 %v1355_v8 }
  0x11   :  { %1195 = vmatprep.subr.bf16.mxu0 %v1289_v0 }
  0xde   :  { %v105_v12 = vpop.f32.mrb[0].mxu0 }
  0xdf   :  { %v106_v13 = vadd.f32 %v105_v12, %v34_v11  ;;  %v1093_v14 = vpop.f32.mrb[1].mxu0 }
  0xe1   :  { %1225 = vtanh.f32 %v106_v13  ;;  %v1014_v17 = vmul.f32 -1.442695, %v106_v13 }
  0xe3   :  { %1227 = vpow2.f32 %v1014_v17 }
  0xeb   :  { %v1226_v15 = vpop.eup %1225 }
  0xec   :  { %123 = vrot.lane.b32.xlu0 %v1226_v15, %s1292_s9 }
  0xed   :  { %v1228_v18 = vpop.eup %1227 }
  0xee   :  { %v112_v19 = vadd.f32 1.0, %v1228_v18  ;;  %v1023_v18 = vld [vmem:[%s1541_s0 + $0x6] sm:$0x3] }
  0xf0   :  { %118 = vrot.lane.b32.xlu0 %v116_v16, %s1293_s10  ;;  %1229 = vrcp.f32 %v112_v19 }
  0xfa   :  { %v1230_v20 = vpop.eup %1229 }
 0x15e   :  { %v124_v21 = vpop.permute.xlu0 %123 }
 0x15f   :  { %v126_v22 = vmul.f32 %v1230_v20, %v124_v21 }
 0x161   :  { %128 = vrot.lane.b32.xlu1 %v126_v22, %s1293_s10 }
 0x162   :  { %v119_v23 = vpop.permute.xlu0 %118 }
 0x163   :  { %v121_v24 = vmul.f32 %v1230_v20, %v119_v23 }
 0x1d3   :  { %v129_v25 = vpop.permute.xlu1 %128 }
 0x1d4   :  { %v131_v26 = vadd.f32 %v129_v25, %v121_v24 }
 0x1d6   :  { %1231 = vtanh.f32 %v131_v26 }
 0x1e0   :  { %v1232_v27 = vpop.eup %1231 }
 0x1e1   :  { %134 = vrot.lane.b32.xlu1 %v1232_v27, %s1292_s9 }
 0x1e5   :  { %145 = vrot.lane.b32.xlu1 %v131_v26, %s1294_s3 }
 0x253   :  { %v135_v28 = vpop.permute.xlu1 %134 }
 0x254   :  { %v137_v29 = vmul.f32 %v1230_v20, %v135_v28 }
 0x256   :  { %139 = vrot.lane.b32.xlu0 %v137_v29, %s1293_s10 }
 0x257   :  { %v146_v30 = vpop.permute.xlu1 %145 }
 0x258   :  { %148 = vst.msk [vmem:[#allocation3] sm:$0x3] %vm25_vm0, %v146_v30 }
 0x25f   :  { %v237_v31 = vld [vmem:[#allocation3] sm:$0x3] }
 0x260   :  { %239 = vrot.lane.b32.xlu1 %v237_v31, %s1293_s10 }
 0x2c8   :  { %v140_v32 = vpop.permute.xlu0 %139 }
 0x2c9   :  { %143 = vst.msk [vmem:[#allocation2] sm:$0x3] %vm25_vm0, %v140_v32  ;;  %149 = vst.msk [vmem:[%s1542_s4] sm:$0x3] %vm25_vm0, %v140_v32 }
 0x2d0   :  { %v150_v33 = vld [vmem:[#allocation2] sm:$0x3] }
 0x2d1   :  { %1103 = vmatmul.mubr.msk.f32.vlgmr.msra.gmra.mrb[0].mxu1 %vm35_vm2, %v150_v33 }
 0x2d2   :  { %1191 = vmatpush3.bf16.msra.mxu1 %v1342_v5  ;;  %1124 = vmatprep.mubr.msk.f32.mxu1 %vm1290_vm1, %v1291_v4  ;;  %v240_v45 = vpop.permute.xlu1 %239 }
 0x2d3   :  { %1192 = vmatprep.subr.bf16.mxu1 %v1289_v0 }
 0x2d6   :  { %1194 = vmatpush3.bf16.msra.mxu1 %v1355_v8 }
 0x2d7   :  { %1201 = vmatprep.subr.bf16.mxu1 %v1289_v0 }
 0x3a4   :  { %v226_v35 = vpop.f32.mrb[0].mxu1 }
 0x3a5   :  { %v227_v36 = vadd.f32 %v1015_v34, %v226_v35  ;;  %v1104_v37 = vpop.f32.mrb[1].mxu1 }
 0x3a7   :  { %1233 = vtanh.f32 %v227_v36  ;;  %v1017_v39 = vmul.f32 -1.442695, %v227_v36 }
 0x3a9   :  { %1235 = vpow2.f32 %v1017_v39 }
 0x3b1   :  { %v1234_v38 = vpop.eup %1233 }
 0x3b2   :  { %244 = vrot.lane.b32.xlu0 %v1234_v38, %s1292_s9 }
 0x3b3   :  { %v1236_v40 = vpop.eup %1235 }
 0x3b4   :  { %v233_v41 = vadd.f32 1.0, %v1236_v40  ;;  %v1027_v40 = vld [vmem:[%s1541_s0 + $0x8] sm:$0x3] }
 0x3b6   :  { %1237 = vrcp.f32 %v233_v41 }
 0x3c0   :  { %v1238_v42 = vpop.eup %1237 }
 0x3c1   :  { %v242_v46 = vmul.f32 %v1238_v42, %v240_v45 }
 0x424   :  { %v245_v43 = vpop.permute.xlu0 %244 }
 0x425   :  { %v247_v44 = vmul.f32 %v1238_v42, %v245_v43 }
 0x427   :  { %249 = vrot.lane.b32.xlu0 %v247_v44, %s1293_s10 }
 0x499   :  { %v250_v47 = vpop.permute.xlu0 %249 }
 0x49a   :  { %v252_v48 = vadd.f32 %v250_v47, %v242_v46 }
 0x49c   :  { %1239 = vtanh.f32 %v252_v48 }
 0x4a6   :  { %v1240_v49 = vpop.eup %1239 }
 0x4a7   :  { %255 = vrot.lane.b32.xlu1 %v1240_v49, %s1292_s9 }
 0x4ab   :  { %265 = vrot.lane.b32.xlu1 %v252_v48, %s1294_s3 }
 0x519   :  { %v256_v50 = vpop.permute.xlu1 %255 }
 0x51a   :  { %v258_v51 = vmul.f32 %v1238_v42, %v256_v50 }
 0x51c   :  { %260 = vrot.lane.b32.xlu0 %v258_v51, %s1293_s10 }
 0x51d   :  { %v266_v52 = vpop.permute.xlu1 %265 }
 0x51e   :  { %268 = vst.msk [vmem:[#allocation3] sm:$0x3] %vm25_vm0, %v266_v52 }
 0x525   :  { %v358_v53 = vld [vmem:[#allocation3] sm:$0x3] }
 0x526   :  { %360 = vrot.lane.b32.xlu1 %v358_v53, %s1293_s10 }
 0x58e   :  { %v261_v54 = vpop.permute.xlu0 %260 }
 0x58f   :  { %263 = vst.msk [vmem:[#allocation2] sm:$0x3] %vm25_vm0, %v261_v54  ;;  %1018 = vst.msk [vmem:[%s1542_s4 + $0x2] sm:$0x3] %vm25_vm0, %v261_v54 }
 0x596   :  { %v271_v55 = vld [vmem:[#allocation2] sm:$0x3] }
 0x597   :  { %1114 = vmatmul.mubr.msk.f32.vlgmr.msra.gmra.mrb[2].mxu0 %vm35_vm2, %v271_v55 }
 0x598   :  { %1197 = vmatpush3.bf16.msra.mxu0 %v1342_v5  ;;  %1135 = vmatprep.mubr.msk.f32.mxu0 %vm1290_vm1, %v1291_v4  ;;  %v361_v6 = vpop.permute.xlu1 %360 }
 0x599   :  { %1198 = vmatprep.subr.bf16.mxu0 %v1289_v0 }
 0x59c   :  { %1200 = vmatpush3.bf16.msra.mxu0 %v1355_v8 }
 0x59d   :  { %1207 = vmatprep.subr.bf16.mxu0 %v1289_v0 }
 0x66a   :  { %v347_v57 = vpop.f32.mrb[2].mxu0 }
 0x66b   :  { %v348_v58 = vadd.f32 %v1019_v56, %v347_v57  ;;  %v1115_v59 = vpop.f32.mrb[3].mxu0 }
 0x66d   :  { %1241 = vtanh.f32 %v348_v58  ;;  %v1021_v61 = vmul.f32 -1.442695, %v348_v58 }
 0x66f   :  { %1243 = vpow2.f32 %v1021_v61 }
 0x677   :  { %v1242_v60 = vpop.eup %1241 }
 0x678   :  { %365 = vrot.lane.b32.xlu0 %v1242_v60, %s1292_s9 }
 0x679   :  { %v1244_v62 = vpop.eup %1243 }
 0x67a   :  { %v354_v63 = vadd.f32 1.0, %v1244_v62  ;;  %v1031_v62 = vld [vmem:[%s1541_s0 + $0xa] sm:$0x3] }
 0x67c   :  { %1245 = vrcp.f32 %v354_v63 }
 0x686   :  { %v1246_v1 = vpop.eup %1245 }
 0x687   :  { %v363_v7 = vmul.f32 %v1246_v1, %v361_v6 }
 0x6ea   :  { %v366_v2 = vpop.permute.xlu0 %365 }
 0x6eb   :  { %v368_v3 = vmul.f32 %v1246_v1, %v366_v2 }
 0x6ed   :  { %370 = vrot.lane.b32.xlu0 %v368_v3, %s1293_s10 }
 0x75f   :  { %v371_v9 = vpop.permute.xlu0 %370 }
 0x760   :  { %v373_v10 = vadd.f32 %v371_v9, %v363_v7 }
 0x762   :  { %1247 = vtanh.f32 %v373_v10 }
 0x76c   :  { %v1248_v11 = vpop.eup %1247 }
 0x76d   :  { %376 = vrot.lane.b32.xlu1 %v1248_v11, %s1292_s9 }
 0x771   :  { %386 = vrot.lane.b32.xlu1 %v373_v10, %s1294_s3 }
 0x7df   :  { %v377_v12 = vpop.permute.xlu1 %376 }
 0x7e0   :  { %v379_v13 = vmul.f32 %v1246_v1, %v377_v12 }
 0x7e2   :  { %381 = vrot.lane.b32.xlu0 %v379_v13, %s1293_s10 }
 0x7e3   :  { %v387_v14 = vpop.permute.xlu1 %386 }
 0x7e4   :  { %389 = vst.msk [vmem:[#allocation3] sm:$0x3] %vm25_vm0, %v387_v14 }
 0x7eb   :  { %v479_v15 = vld [vmem:[#allocation3] sm:$0x3] }
 0x7ec   :  { %481 = vrot.lane.b32.xlu1 %v479_v15, %s1293_s10 }
 0x854   :  { %v382_v16 = vpop.permute.xlu0 %381 }
 0x855   :  { %384 = vst.msk [vmem:[#allocation2] sm:$0x3] %vm25_vm0, %v382_v16  ;;  %1022 = vst.msk [vmem:[%s1542_s4 + $0x4] sm:$0x3] %vm25_vm0, %v382_v16 }
 0x85c   :  { %v392_v17 = vld [vmem:[#allocation2] sm:$0x3] }
 0x85d   :  { %1125 = vmatmul.mubr.msk.f32.vlgmr.msra.gmra.mrb[2].mxu1 %vm35_vm2, %v392_v17 }
 0x85e   :  { %1203 = vmatpush3.bf16.msra.mxu1 %v1342_v5  ;;  %1146 = vmatprep.mubr.msk.f32.mxu1 %vm1290_vm1, %v1291_v4  ;;  %v482_v29 = vpop.permute.xlu1 %481 }
 0x85f   :  { %1204 = vmatprep.subr.bf16.mxu1 %v1289_v0 }
 0x862   :  { %1206 = vmatpush3.bf16.msra.mxu1 %v1355_v8 }
 0x863   :  { %1213 = vmatprep.subr.bf16.mxu1 %v1289_v0 }
 0x930   :  { %v468_v19 = vpop.f32.mrb[2].mxu1 }
 0x931   :  { %v469_v20 = vadd.f32 %v1023_v18, %v468_v19  ;;  %v1126_v21 = vpop.f32.mrb[3].mxu1 }
 0x933   :  { %1249 = vtanh.f32 %v469_v20  ;;  %v1025_v23 = vmul.f32 -1.442695, %v469_v20  ;;  %v1035_v20 = vld [vmem:[%s1541_s0 + $0xc] sm:$0x3] }
 0x935   :  { %1251 = vpow2.f32 %v1025_v23 }
 0x93d   :  { %v1250_v22 = vpop.eup %1249 }
 0x93e   :  { %486 = vrot.lane.b32.xlu0 %v1250_v22, %s1292_s9 }
 0x93f   :  { %v1252_v24 = vpop.eup %1251 }
 0x940   :  { %v475_v25 = vadd.f32 1.0, %v1252_v24 }
 0x942   :  { %1253 = vrcp.f32 %v475_v25 }
 0x94c   :  { %v1254_v26 = vpop.eup %1253 }
 0x94d   :  { %v484_v30 = vmul.f32 %v1254_v26, %v482_v29 }
 0x9b0   :  { %v487_v27 = vpop.permute.xlu0 %486 }
 0x9b1   :  { %v489_v28 = vmul.f32 %v1254_v26, %v487_v27 }
 0x9b3   :  { %491 = vrot.lane.b32.xlu0 %v489_v28, %s1293_s10 }
 0xa25   :  { %v492_v31 = vpop.permute.xlu0 %491 }
 0xa26   :  { %v494_v32 = vadd.f32 %v492_v31, %v484_v30 }
 0xa28   :  { %1255 = vtanh.f32 %v494_v32 }
 0xa32   :  { %v1256_v33 = vpop.eup %1255 }
 0xa33   :  { %497 = vrot.lane.b32.xlu1 %v1256_v33, %s1292_s9 }
 0xa37   :  { %507 = vrot.lane.b32.xlu1 %v494_v32, %s1294_s3 }
 0xaa5   :  { %v498_v34 = vpop.permute.xlu1 %497 }
 0xaa6   :  { %v500_v35 = vmul.f32 %v1254_v26, %v498_v34 }
 0xaa8   :  { %502 = vrot.lane.b32.xlu0 %v500_v35, %s1293_s10 }
 0xaa9   :  { %v508_v36 = vpop.permute.xlu1 %507 }
 0xaaa   :  { %510 = vst.msk [vmem:[#allocation3] sm:$0x3] %vm25_vm0, %v508_v36 }
 0xab1   :  { %v600_v37 = vld [vmem:[#allocation3] sm:$0x3] }
 0xab2   :  { %602 = vrot.lane.b32.xlu1 %v600_v37, %s1293_s10 }
 0xb1a   :  { %v503_v38 = vpop.permute.xlu0 %502 }
 0xb1b   :  { %505 = vst.msk [vmem:[#allocation2] sm:$0x3] %vm25_vm0, %v503_v38  ;;  %1026 = vst.msk [vmem:[%s1542_s4 + $0x6] sm:$0x3] %vm25_vm0, %v503_v38 }
 0xb22   :  { %v513_v39 = vld [vmem:[#allocation2] sm:$0x3] }
 0xb23   :  { %1136 = vmatmul.mubr.msk.f32.vlgmr.msra.gmra.mrb[4].mxu0 %vm35_vm2, %v513_v39 }
 0xb24   :  { %1209 = vmatpush3.bf16.msra.mxu0 %v1342_v5  ;;  %1157 = vmatprep.mubr.msk.f32.mxu0 %vm1290_vm1, %v1291_v4  ;;  %v603_v51 = vpop.permute.xlu1 %602 }
 0xb25   :  { %1210 = vmatprep.subr.bf16.mxu0 %v1289_v0 }
 0xb28   :  { %1212 = vmatpush3.bf16.msra.mxu0 %v1355_v8 }
 0xbf6   :  { %v589_v41 = vpop.f32.mrb[4].mxu0 }
 0xbf7   :  { %v590_v42 = vadd.f32 %v1027_v40, %v589_v41  ;;  %v1137_v43 = vpop.f32.mrb[5].mxu0 }
 0xbf9   :  { %1257 = vtanh.f32 %v590_v42  ;;  %v1029_v45 = vmul.f32 -1.442695, %v590_v42  ;;  %v1039_v42 = vld [vmem:[%s1541_s0 + $0xe] sm:$0x3] }
 0xbfb   :  { %1259 = vpow2.f32 %v1029_v45 }
 0xc03   :  { %v1258_v44 = vpop.eup %1257 }
 0xc04   :  { %607 = vrot.lane.b32.xlu0 %v1258_v44, %s1292_s9 }
 0xc05   :  { %v1260_v46 = vpop.eup %1259 }
 0xc06   :  { %v596_v47 = vadd.f32 1.0, %v1260_v46 }
 0xc08   :  { %1261 = vrcp.f32 %v596_v47 }
 0xc12   :  { %v1262_v48 = vpop.eup %1261 }
 0xc13   :  { %v605_v52 = vmul.f32 %v1262_v48, %v603_v51 }
 0xc76   :  { %v608_v49 = vpop.permute.xlu0 %607 }
 0xc77   :  { %v610_v50 = vmul.f32 %v1262_v48, %v608_v49 }
 0xc79   :  { %612 = vrot.lane.b32.xlu0 %v610_v50, %s1293_s10 }
 0xceb   :  { %v613_v53 = vpop.permute.xlu0 %612 }
 0xcec   :  { %v615_v54 = vadd.f32 %v613_v53, %v605_v52 }
 0xcee   :  { %1263 = vtanh.f32 %v615_v54 }
 0xcf8   :  { %v1264_v55 = vpop.eup %1263 }
 0xcf9   :  { %618 = vrot.lane.b32.xlu1 %v1264_v55, %s1292_s9 }
 0xcfd   :  { %628 = vrot.lane.b32.xlu1 %v615_v54, %s1294_s3 }
 0xd6b   :  { %v619_v56 = vpop.permute.xlu1 %618 }
 0xd6c   :  { %v621_v57 = vmul.f32 %v1262_v48, %v619_v56 }
 0xd6e   :  { %623 = vrot.lane.b32.xlu0 %v621_v57, %s1293_s10 }
 0xd6f   :  { %v629_v58 = vpop.permute.xlu1 %628 }
 0xd70   :  { %631 = vst.msk [vmem:[#allocation3] sm:$0x3] %vm25_vm0, %v629_v58 }
 0xd77   :  { %v721_v59 = vld [vmem:[#allocation3] sm:$0x3] }
 0xd78   :  { %723 = vrot.lane.b32.xlu1 %v721_v59, %s1293_s10 }
 0xde0   :  { %v624_v60 = vpop.permute.xlu0 %623 }
 0xde1   :  { %626 = vst.msk [vmem:[#allocation2] sm:$0x3] %vm25_vm0, %v624_v60  ;;  %1030 = vst.msk [vmem:[%s1542_s4 + $0x8] sm:$0x3] %vm25_vm0, %v624_v60 }
 0xde8   :  { %v634_v61 = vld [vmem:[#allocation2] sm:$0x3] }
 0xde9   :  { %1147 = vmatmul.mubr.msk.f32.vlgmr.msra.gmra.mrb[4].mxu1 %vm35_vm2, %v634_v61 }
 0xdea   :  { %1215 = vmatpush3.bf16.msra.mxu1 %v1342_v5  ;;  %1168 = vmatprep.mubr.msk.f32.mxu1 %vm1290_vm1, %v1291_v4 }
 0xdeb   :  { %1216 = vmatprep.subr.bf16.mxu1 %v1289_v0 }
 0xdee   :  { %1218 = vmatpush3.bf16.msra.mxu1 %v1355_v8  ;;  %v724_v8 = vpop.permute.xlu1 %723 }
 0xebc   :  { %v710_v63 = vpop.f32.mrb[4].mxu1 }
 0xebd   :  { %v711_v1 = vadd.f32 %v1031_v62, %v710_v63  ;;  %v1148_v2 = vpop.f32.mrb[5].mxu1 }
 0xebf   :  { %1265 = vtanh.f32 %v711_v1  ;;  %v1033_v6 = vmul.f32 -1.442695, %v711_v1 }
 0xec1   :  { %1267 = vpow2.f32 %v1033_v6 }
 0xec9   :  { %v1266_v3 = vpop.eup %1265 }
 0xeca   :  { %728 = vrot.lane.b32.xlu0 %v1266_v3, %s1292_s9 }
 0xecb   :  { %v1268_v5 = vpop.eup %1267 }
 0xecc   :  { %v717_v7 = vadd.f32 1.0, %v1268_v5 }
 0xece   :  { %1269 = vrcp.f32 %v717_v7 }
 0xed8   :  { %v1270_v4 = vpop.eup %1269 }
 0xed9   :  { %v726_v10 = vmul.f32 %v1270_v4, %v724_v8 }
 0xf3c   :  { %v729_v0 = vpop.permute.xlu0 %728 }
 0xf3d   :  { %v731_v9 = vmul.f32 %v1270_v4, %v729_v0 }
 0xf3f   :  { %733 = vrot.lane.b32.xlu0 %v731_v9, %s1293_s10 }
 0xfb1   :  { %v734_v11 = vpop.permute.xlu0 %733 }
 0xfb2   :  { %v736_v12 = vadd.f32 %v734_v11, %v726_v10 }
 0xfb4   :  { %1271 = vtanh.f32 %v736_v12 }
 0xfbe   :  { %v1272_v13 = vpop.eup %1271 }
 0xfbf   :  { %739 = vrot.lane.b32.xlu1 %v1272_v13, %s1292_s9 }
 0xfc3   :  { %749 = vrot.lane.b32.xlu1 %v736_v12, %s1294_s3 }
0x1031   :  { %v740_v14 = vpop.permute.xlu1 %739 }
0x1032   :  { %v742_v15 = vmul.f32 %v1270_v4, %v740_v14 }
0x1034   :  { %744 = vrot.lane.b32.xlu0 %v742_v15, %s1293_s10 }
0x1035   :  { %v750_v16 = vpop.permute.xlu1 %749 }
0x1036   :  { %752 = vst.msk [vmem:[#allocation3] sm:$0x3] %vm25_vm0, %v750_v16 }
0x103d   :  { %v842_v17 = vld [vmem:[#allocation3] sm:$0x3] }
0x103e   :  { %844 = vrot.lane.b32.xlu1 %v842_v17, %s1293_s10 }
0x10a6   :  { %v745_v18 = vpop.permute.xlu0 %744 }
0x10a7   :  { %747 = vst.msk [vmem:[#allocation2] sm:$0x3] %vm25_vm0, %v745_v18  ;;  %1034 = vst.msk [vmem:[%s1542_s4 + $0xa] sm:$0x3] %vm25_vm0, %v745_v18 }
0x10ae   :  { %v755_v19 = vld [vmem:[#allocation2] sm:$0x3] }
0x10af   :  { %1158 = vmatmul.mubr.msk.f32.vlgmr.msra.gmra.mrb[6].mxu0 %vm35_vm2, %v755_v19 }
0x10b0   :  { %v845_v31 = vpop.permute.xlu1 %844 }
0x1182   :  { %v831_v21 = vpop.f32.mrb[6].mxu0 }
0x1183   :  { %v832_v22 = vadd.f32 %v1035_v20, %v831_v21  ;;  %v1159_v23 = vpop.f32.mrb[7].mxu0 }
0x1185   :  { %1273 = vtanh.f32 %v832_v22  ;;  %v1037_v25 = vmul.f32 -1.442695, %v832_v22 }
0x1187   :  { %1275 = vpow2.f32 %v1037_v25 }
0x118f   :  { %v1274_v24 = vpop.eup %1273 }
0x1190   :  { %849 = vrot.lane.b32.xlu0 %v1274_v24, %s1292_s9 }
0x1191   :  { %v1276_v26 = vpop.eup %1275 }
0x1192   :  { %v838_v27 = vadd.f32 1.0, %v1276_v26 }
0x1194   :  { %1277 = vrcp.f32 %v838_v27 }
0x119e   :  { %v1278_v28 = vpop.eup %1277 }
0x119f   :  { %v847_v32 = vmul.f32 %v1278_v28, %v845_v31 }
0x1202   :  { %v850_v29 = vpop.permute.xlu0 %849 }
0x1203   :  { %v852_v30 = vmul.f32 %v1278_v28, %v850_v29 }
0x1205   :  { %854 = vrot.lane.b32.xlu0 %v852_v30, %s1293_s10 }
0x1277   :  { %v855_v33 = vpop.permute.xlu0 %854 }
0x1278   :  { %v857_v34 = vadd.f32 %v855_v33, %v847_v32 }
0x127a   :  { %1279 = vtanh.f32 %v857_v34 }
0x1284   :  { %v1280_v35 = vpop.eup %1279 }
0x1285   :  { %860 = vrot.lane.b32.xlu1 %v1280_v35, %s1292_s9 }
0x1289   :  { %870 = vrot.lane.b32.xlu1 %v857_v34, %s1294_s3 }
0x12f7   :  { %v861_v36 = vpop.permute.xlu1 %860 }
0x12f8   :  { %v863_v37 = vmul.f32 %v1278_v28, %v861_v36 }
0x12fa   :  { %865 = vrot.lane.b32.xlu0 %v863_v37, %s1293_s10 }
0x12fb   :  { %v871_v38 = vpop.permute.xlu1 %870 }
0x12fc   :  { %873 = vst.msk [vmem:[#allocation3] sm:$0x3] %vm25_vm0, %v871_v38 }
0x1303   :  { %v963_v39 = vld [vmem:[#allocation3] sm:$0x3] }
0x1304   :  { %965 = vrot.lane.b32.xlu1 %v963_v39, %s1293_s10 }
0x136c   :  { %v866_v40 = vpop.permute.xlu0 %865 }
0x136d   :  { %868 = vst.msk [vmem:[#allocation2] sm:$0x3] %vm25_vm0, %v866_v40  ;;  %1038 = vst.msk [vmem:[%s1542_s4 + $0xc] sm:$0x3] %vm25_vm0, %v866_v40 }
0x1374   :  { %v876_v41 = vld [vmem:[#allocation2] sm:$0x3] }
0x1375   :  { %1169 = vmatmul.mubr.msk.f32.vlgmr.msra.gmra.mrb[6].mxu1 %vm35_vm2, %v876_v41 }
0x1376   :  { %v966_v53 = vpop.permute.xlu1 %965 }
0x1448   :  { %v952_v43 = vpop.f32.mrb[6].mxu1 }
0x1449   :  { %v953_v44 = vadd.f32 %v1039_v42, %v952_v43  ;;  %v1170_v45 = vpop.f32.mrb[7].mxu1 }
0x144b   :  { %1281 = vtanh.f32 %v953_v44  ;;  %v1041_v47 = vmul.f32 -1.442695, %v953_v44 }
0x144d   :  { %1283 = vpow2.f32 %v1041_v47 }
0x1455   :  { %v1282_v46 = vpop.eup %1281 }
0x1456   :  { %970 = vrot.lane.b32.xlu0 %v1282_v46, %s1292_s9 }
0x1457   :  { %v1284_v48 = vpop.eup %1283 }
0x1458   :  { %v959_v49 = vadd.f32 1.0, %v1284_v48 }
0x145a   :  { %1285 = vrcp.f32 %v959_v49 }
0x1464   :  { %v1286_v50 = vpop.eup %1285 }
0x1465   :  { %v968_v54 = vmul.f32 %v1286_v50, %v966_v53 }
0x14c8   :  { %v971_v51 = vpop.permute.xlu0 %970 }
0x14c9   :  { %v973_v52 = vmul.f32 %v1286_v50, %v971_v51 }
0x14cb   :  { %975 = vrot.lane.b32.xlu0 %v973_v52, %s1293_s10 }
0x153d   :  { %v976_v55 = vpop.permute.xlu0 %975 }
0x153e   :  { %v978_v56 = vadd.f32 %v976_v55, %v968_v54 }
0x1540   :  { %1287 = vtanh.f32 %v978_v56 }
0x154a   :  { %v1288_v57 = vpop.eup %1287 }
0x154b   :  { %981 = vrot.lane.b32.xlu1 %v1288_v57, %s1292_s9 }
0x154f   :  { %991 = vrot.lane.b32.xlu1 %v978_v56, %s1294_s3 }
0x15bd   :  { %v982_v58 = vpop.permute.xlu1 %981 }
0x15be   :  { %v984_v59 = vmul.f32 %v1286_v50, %v982_v58 }
0x15c0   :  { %986 = vrot.lane.b32.xlu0 %v984_v59, %s1293_s10 }
0x15c1   :  { %v992_v60 = vpop.permute.xlu1 %991 }
0x15c2   :  { %994 = vst.msk [vmem:[#allocation3] sm:$0x3] %vm25_vm0, %v992_v60 }
0x15c9   :  { %v999_v61 = vld [vmem:[#allocation3] sm:$0x3] }
0x15ca   :  { %1000 = vst.msk [vmem:[%s1543_s6] sm:$0x3] %vm25_vm0, %v999_v61 }
0x1632   :  { %v987_v62 = vpop.permute.xlu0 %986 }
0x1633   :  { %989 = vst.msk [vmem:[#allocation2] sm:$0x3] %vm25_vm0, %v987_v62  ;;  %1042 = vst.msk [vmem:[%s1542_s4 + $0xe] sm:$0x3] %vm25_vm0, %v987_v62 }
0x163a   :  { %v997_v63 = vld [vmem:[#allocation2] sm:$0x3] }
0x163b   :  { %998 = vst.msk [vmem:[%s1544_s5] sm:$0x3] %vm25_vm0, %v997_v63 }

</bundles_post_ra>
